<compile_context>
chip_gen: v6e
topology: v6e:2x2x1
jax: 0.10.0
libtpu: 0.0.40
codegen_flags: <defaults>
</compile_context>

<pallas_src>
import jax
import jax.numpy as jnp
from jax.experimental import pallas as pl
from jax.experimental.pallas import tpu as pltpu


# ---------------------------------------------------------------------------
# Pallas kernel: one batch element per grid step.
# ---------------------------------------------------------------------------
def bottleneck_kernel(x_ref,                # (1, H, W, CP)     bf16
                      w1_ref, b1_ref,       # (CP, WP) bf16, (1, WP) f32
                      w2_ref, b2_ref,       # (9, WP, WP) bf16, (1, WP) f32
                      w3_ref, b3_ref,       # (WP, CP) bf16, (1, CP) f32
                      o_ref,                # (1, H, W, CP)     bf16
                      pad_ref,              # VMEM (H+2, W+2, WP) bf16
                      acc_ref):             # VMEM (H*W, WP)      f32
    _, H, W, CP = x_ref.shape
    WP = w1_ref.shape[1]

    # Zero the 1-pixel halo border EVERY grid step.  (Gating on
    # pl.program_id(0) == 0 is wrong on v7x: with the batch axis 'parallel'
    # the grid is sharded across 2 TensorCores, each with its own scratch, so
    # the core that never runs global step 0 would read stale VMEM garbage in
    # the halo.)  The interior is fully overwritten below, so only the four
    # border strips need zeroing -- negligible cost.
    pad_ref[0:1, :, :] = jnp.zeros((1, W + 2, WP), pad_ref.dtype)
    pad_ref[H + 1:H + 2, :, :] = jnp.zeros((1, W + 2, WP), pad_ref.dtype)
    pad_ref[:, 0:1, :] = jnp.zeros((H + 2, 1, WP), pad_ref.dtype)
    pad_ref[:, W + 1:W + 2, :] = jnp.zeros((H + 2, 1, WP), pad_ref.dtype)

    x = x_ref[0]                               # (H, W, CP) bf16
    x2d = x.reshape(H * W, CP)

    # --- conv1 (1x1, BN scale folded into w1) + bias + relu ---------------
    t1 = jnp.dot(x2d, w1_ref[...], preferred_element_type=jnp.float32)
    t1 = jnp.maximum(t1 + b1_ref[...], 0.0)    # (HW, WP) f32
    pad_ref[1:H + 1, 1:W + 1, :] = t1.reshape(H, W, WP).astype(pad_ref.dtype)

    # --- conv2 (3x3, stride 1, pad 1): 9 accumulating MXU matmuls ---------
    # Each tap reads its shifted (H, W, WP) window directly from pad_ref and
    # accumulates into a single f32 scratch (no im2col slab).
    for tap in range(9):                       # static -> fully unrolled
        dy, dx = tap // 3, tap % 3
        win = pad_ref[dy:dy + H, dx:dx + W, :].reshape(H * W, WP)   # bf16
        part = jnp.dot(win, w2_ref[tap], preferred_element_type=jnp.float32)
        if tap == 0:
            acc_ref[...] = part
        else:
            acc_ref[...] += part
    t2 = jnp.maximum(acc_ref[...] + b2_ref[...], 0.0)   # (HW, WP) f32

    # --- conv3 (1x1) + bias + residual + relu -> bf16 store ---------------
    t3 = jnp.dot(t2.astype(jnp.bfloat16), w3_ref[...],
                 preferred_element_type=jnp.float32)
    t3 = t3 + b3_ref[...] + x2d.astype(jnp.float32)
    o_ref[0] = jnp.maximum(t3, 0.0).reshape(H, W, CP).astype(o_ref.dtype)


# ---------------------------------------------------------------------------
# Helpers
# ---------------------------------------------------------------------------
def _rup(n, m=128):
    return ((n + m - 1) // m) * m


def _pad_axis(a, axis, target):
    if a.shape[axis] == target:
        return a
    cfg = [(0, 0)] * a.ndim
    cfg[axis] = (0, target - a.shape[axis])
    return jnp.pad(a, cfg)


def fold_bottleneck_params(conv1_w, bn1, conv2_w, bn2, conv3_w, bn3):
    """Fold eval-mode BN into the conv weights, re-layout for NHWC matmuls,
    pad channels to lane-dense multiples of 128, cast to bf16."""
    width = conv1_w.shape[0]
    Cin = conv1_w.shape[1]
    Cout = conv3_w.shape[0]
    WP = _rup(width)
    CP = _rup(max(Cin, Cout))

    def fold(p):
        gamma, beta, mean, var = p
        s = gamma / jnp.sqrt(var + 1e-5)
        return s, beta - mean * s

    s1, b1 = fold(bn1)
    s2, b2 = fold(bn2)
    s3, b3 = fold(bn3)

    w1 = conv1_w[:, :, 0, 0].T * s1[None, :]                             # (Cin, width)
    w2 = jnp.transpose(conv2_w, (2, 3, 1, 0)) * s2[None, None, None, :]  # (3,3,in,out)
    w3 = conv3_w[:, :, 0, 0].T * s3[None, :]                             # (width, Cout)

    w1p = _pad_axis(_pad_axis(w1, 0, CP), 1, WP).astype(jnp.bfloat16)
    w2p = (_pad_axis(_pad_axis(w2, 2, WP), 3, WP)
           .reshape(9, WP, WP).astype(jnp.bfloat16))       # 9 per-tap tiles
    w3p = _pad_axis(_pad_axis(w3, 0, WP), 1, CP).astype(jnp.bfloat16)
    b1p = _pad_axis(b1, 0, WP).reshape(1, WP).astype(jnp.float32)
    b2p = _pad_axis(b2, 0, WP).reshape(1, WP).astype(jnp.float32)
    b3p = _pad_axis(b3, 0, CP).reshape(1, CP).astype(jnp.float32)
    return (w1p, b1p, w2p, b2p, w3p, b3p), WP, CP


# ---------------------------------------------------------------------------
# Hot path: channel-padded NHWC bf16 in -> channel-padded NHWC bf16 out.
# Chain this block-to-block in a full ResNet; layout conversion is done once
# per model, outside the per-block path.
# ---------------------------------------------------------------------------
def bottleneck_block_nhwc(x_nhwc, params, WP, CP):
    w1p, b1p, w2p, b2p, w3p, b3p = params
    N, H, W, _ = x_nhwc.shape

    # Explicit scoped-VMEM budget sized from the real per-step footprint.
    blk_bytes = H * W * CP * 2                                   # bf16 block
    weight_bytes = ((w1p.size + w2p.size + w3p.size) * 2
                    + (b1p.size + b2p.size + b3p.size) * 4)
    scratch_bytes = (H + 2) * (W + 2) * WP * 2 + H * W * WP * 4
    vmem_limit = int(1.5 * (2 * blk_bytes            # input double buffer
                            + 2 * blk_bytes          # output double buffer
                            + 2 * weight_bytes       # weight double buffer
                            + scratch_bytes)) + (4 << 20)
    vmem_limit = min(max(vmem_limit, 16 << 20), 100 << 20)

    flops = 2 * N * H * W * (CP * WP + 9 * WP * WP + WP * CP)
    bytes_accessed = 2 * N * H * W * CP * 2 + weight_bytes

    def full(shape):
        nd = len(shape)
        return pl.BlockSpec(shape, lambda n: (0,) * nd)

    return pl.pallas_call(
        bottleneck_kernel,
        out_shape=jax.ShapeDtypeStruct((N, H, W, CP), jnp.bfloat16),
        grid=(N,),
        in_specs=[
            pl.BlockSpec((1, H, W, CP), lambda n: (n, 0, 0, 0)),
            full(w1p.shape), full(b1p.shape),
            full(w2p.shape), full(b2p.shape),
            full(w3p.shape), full(b3p.shape),
        ],
        out_specs=pl.BlockSpec((1, H, W, CP), lambda n: (n, 0, 0, 0)),
        scratch_shapes=[
            pltpu.VMEM((H + 2, W + 2, WP), jnp.bfloat16),   # zero-halo buffer
            pltpu.VMEM((H * W, WP), jnp.float32),            # conv2 accumulator
        ],
        compiler_params=pltpu.CompilerParams(
            dimension_semantics=("parallel",),
            vmem_limit_bytes=vmem_limit),
        cost_estimate=pl.CostEstimate(
            flops=flops, transcendentals=0, bytes_accessed=bytes_accessed),
    )(x_nhwc, w1p, b1p, w2p, b2p, w3p, b3p)


# ---------------------------------------------------------------------------
# PyTorch-layout wrapper: NCHW in / NCHW out, mirrors Bottleneck.forward.
# ---------------------------------------------------------------------------
def bottleneck_forward(inputs, conv1_w, bn1, conv2_w, bn2, conv3_w, bn3):
    x_nchw, gammas = inputs
    N, Cin, H, W = x_nchw.shape
    Cout = conv3_w.shape[0]
    assert Cin == Cout, "identity residual requires Cin == Cout (no downsample)"
    # TODO(synk): projection shortcut / stride>1 / groups>1 / dilation>1 not
    # supported by this kernel.

    params, WP, CP = fold_bottleneck_params(
        conv1_w, bn1, conv2_w, bn2, conv3_w, bn3)

    # One-time layout conversion: NCHW -> channel-padded NHWC bf16.
    x = jnp.transpose(x_nchw, (0, 2, 3, 1))
    x = _pad_axis(x, 3, CP).astype(jnp.bfloat16)

    out_nhwc = bottleneck_block_nhwc(x, params, WP, CP)

    out = out_nhwc[..., :Cout]
    out = jnp.transpose(out, (0, 3, 1, 2)).astype(x_nchw.dtype)
    return out, gammas


# ---------------------------------------------------------------------------
# Pure-JAX NCHW reference (mirrors the PyTorch module, eval-mode BN).
# ---------------------------------------------------------------------------
def bottleneck_reference(x, w1_oihw, bn1, w2_oihw, bn2, w3_oihw, bn3):
    def conv(x, w, pad):
        return jax.lax.conv_general_dilated(
            x, w, window_strides=(1, 1), padding=pad,
            dimension_numbers=('NCHW', 'OIHW', 'NCHW'),
            precision=jax.lax.Precision.HIGHEST)

    def bn(x, p):
        gamma, beta, mean, var = p
        s = gamma / jnp.sqrt(var + 1e-5)
        return x * s[None, :, None, None] + (beta - mean * s)[None, :, None, None]

    identity = x
    out = jax.nn.relu(bn(conv(x, w1_oihw, 'VALID'), bn1))
    out = jax.nn.relu(bn(conv(out, w2_oihw, ((1, 1), (1, 1))), bn2))
    out = bn(conv(out, w3_oihw, 'VALID'), bn3)
    return jax.nn.relu(out + identity)


if __name__ == "__main__":
    # Shapes consistent with the module: inplanes == planes * expansion so
    # the identity path needs no downsample (downsample=None).
    N, inplanes, Hs, Ws = 2, 16, 8, 8
    planes = 4
    width = planes          # base_width=64, groups=1 -> width = planes
    Cout = planes * 4       # expansion = 4 -> Cout == inplanes

    key = jax.random.PRNGKey(0)
    ks = jax.random.split(key, 16)

    x = jax.random.normal(ks[0], (N, inplanes, Hs, Ws), jnp.float32)
    gammas = jax.random.normal(ks[1], (4,), jnp.float32)   # passed through untouched

    # Conv weights in PyTorch OIHW layout (bias=False).
    conv1_w = jax.random.normal(ks[2], (width, inplanes, 1, 1), jnp.float32) * 0.2
    conv2_w = jax.random.normal(ks[3], (width, width, 3, 3), jnp.float32) * 0.2
    conv3_w = jax.random.normal(ks[4], (Cout, width, 1, 1), jnp.float32) * 0.2

    # Deterministic (non-trivial) eval-mode BatchNorm parameters.
    def make_bn(k, c):
        k1, k2, k3, k4 = jax.random.split(k, 4)
        gamma = 1.0 + 0.1 * jax.random.normal(k1, (c,), jnp.float32)
        beta = 0.1 * jax.random.normal(k2, (c,), jnp.float32)
        mean = 0.1 * jax.random.normal(k3, (c,), jnp.float32)
        var = 1.0 + 0.1 * jnp.abs(jax.random.normal(k4, (c,), jnp.float32))
        return gamma, beta, mean, var

    bn1 = make_bn(ks[5], width)
    bn2 = make_bn(ks[6], width)
    bn3 = make_bn(ks[7], Cout)

    (out, gammas_out) = bottleneck_forward(
        (x, gammas), conv1_w, bn1, conv2_w, bn2, conv3_w, bn3)
    out = jax.block_until_ready(out)

    ref = bottleneck_reference(x, conv1_w, bn1, conv2_w, bn2, conv3_w, bn3)
    assert out.shape == (N, Cout, Hs, Ws)
    # bf16 MXU matmuls + bf16 output vs pure-f32 reference -> loose tolerance.
    assert jnp.allclose(out, ref, atol=5e-2, rtol=5e-2), (
        f"max abs diff {jnp.max(jnp.abs(out - ref))}")
    assert jnp.array_equal(gammas_out, gammas)

    print("KERNEL_OK")
</pallas_src>

<mosaic_0001>
module attributes {stable_mosaic.version = 11 : i64} {
  func.func @bottleneck_kernel(%arg0: i32, %arg1: memref<1x8x8x128xbf16, #tpu.memory_space<vmem>>, %arg2: memref<128x128xbf16, #tpu.memory_space<vmem>>, %arg3: memref<1x128xf32, #tpu.memory_space<vmem>>, %arg4: memref<9x128x128xbf16, #tpu.memory_space<vmem>>, %arg5: memref<1x128xf32, #tpu.memory_space<vmem>>, %arg6: memref<128x128xbf16, #tpu.memory_space<vmem>>, %arg7: memref<1x128xf32, #tpu.memory_space<vmem>>, %arg8: memref<1x8x8x128xbf16, #tpu.memory_space<vmem>>, %arg9: memref<10x10x128xbf16, #tpu.memory_space<vmem>>, %arg10: memref<64x128xf32, #tpu.memory_space<vmem>>) attributes {dimension_semantics = [#tpu.dimension_semantics<parallel>], iteration_bounds = array<i64: 2>, scalar_prefetch = 0 : i64, scratch_operands = 2 : i64, tpu.core_type = #tpu.core_type<tc>, window_params = [{transform_indices = @transform_0, window_bounds = array<i64: 1, 8, 8, 128>}, {pipeline_mode = #tpu.pipeline_mode<synchronous>, transform_indices = @transform_1, window_bounds = array<i64: 128, 128>}, {pipeline_mode = #tpu.pipeline_mode<synchronous>, transform_indices = @transform_2, window_bounds = array<i64: 1, 128>}, {pipeline_mode = #tpu.pipeline_mode<synchronous>, transform_indices = @transform_3, window_bounds = array<i64: 9, 128, 128>}, {pipeline_mode = #tpu.pipeline_mode<synchronous>, transform_indices = @transform_4, window_bounds = array<i64: 1, 128>}, {pipeline_mode = #tpu.pipeline_mode<synchronous>, transform_indices = @transform_5, window_bounds = array<i64: 128, 128>}, {pipeline_mode = #tpu.pipeline_mode<synchronous>, transform_indices = @transform_6, window_bounds = array<i64: 1, 128>}, {transform_indices = @transform_7, window_bounds = array<i64: 1, 8, 8, 128>}]} {
    %cst = arith.constant 0.000000e+00 : bf16
    %0 = vector.broadcast %cst : bf16 to vector<1x10x128xbf16>
    %c0 = arith.constant 0 : index
    %c0_0 = arith.constant 0 : index
    %c0_1 = arith.constant 0 : index
    %1 = vector.load %arg9[%c0, %c0_0, %c0_1] : memref<10x10x128xbf16, #tpu.memory_space<vmem>>, vector<1x10x128xbf16>
    tpu.vector_store %arg9[%c0, %c0_0, %c0_1], %0 {strides = array<i32>} : memref<10x10x128xbf16, #tpu.memory_space<vmem>>, vector<1x10x128xbf16>,
    %cst_2 = arith.constant 0.000000e+00 : bf16
    %2 = vector.broadcast %cst_2 : bf16 to vector<1x10x128xbf16>
    %c9 = arith.constant 9 : index
    %c0_3 = arith.constant 0 : index
    %c0_4 = arith.constant 0 : index
    %3 = vector.load %arg9[%c9, %c0_3, %c0_4] : memref<10x10x128xbf16, #tpu.memory_space<vmem>>, vector<1x10x128xbf16>
    tpu.vector_store %arg9[%c9, %c0_3, %c0_4], %2 {strides = array<i32>} : memref<10x10x128xbf16, #tpu.memory_space<vmem>>, vector<1x10x128xbf16>,
    %cst_5 = arith.constant 0.000000e+00 : bf16
    %4 = vector.broadcast %cst_5 : bf16 to vector<10x1x128xbf16>
    %c0_6 = arith.constant 0 : index
    %c0_7 = arith.constant 0 : index
    %c0_8 = arith.constant 0 : index
    %5 = vector.load %arg9[%c0_6, %c0_7, %c0_8] : memref<10x10x128xbf16, #tpu.memory_space<vmem>>, vector<10x1x128xbf16>
    tpu.vector_store %arg9[%c0_6, %c0_7, %c0_8], %4 {strides = array<i32>} : memref<10x10x128xbf16, #tpu.memory_space<vmem>>, vector<10x1x128xbf16>,
    %cst_9 = arith.constant 0.000000e+00 : bf16
    %6 = vector.broadcast %cst_9 : bf16 to vector<10x1x128xbf16>
    %c0_10 = arith.constant 0 : index
    %c9_11 = arith.constant 9 : index
    %c0_12 = arith.constant 0 : index
    %7 = vector.load %arg9[%c0_10, %c9_11, %c0_12] : memref<10x10x128xbf16, #tpu.memory_space<vmem>>, vector<10x1x128xbf16>
    tpu.vector_store %arg9[%c0_10, %c9_11, %c0_12], %6 {strides = array<i32>} : memref<10x10x128xbf16, #tpu.memory_space<vmem>>, vector<10x1x128xbf16>,
    %c0_13 = arith.constant 0 : index
    %c0_14 = arith.constant 0 : index
    %c0_15 = arith.constant 0 : index
    %c0_16 = arith.constant 0 : index
    %8 = vector.load %arg1[%c0_13, %c0_14, %c0_15, %c0_16] : memref<1x8x8x128xbf16, #tpu.memory_space<vmem>>, vector<1x8x8x128xbf16>
    %9 = vector.shape_cast %8 : vector<1x8x8x128xbf16> to vector<8x8x128xbf16>
    %10 = vector.shape_cast %9 : vector<8x8x128xbf16> to vector<64x128xbf16>
    %c0_17 = arith.constant 0 : index
    %c0_18 = arith.constant 0 : index
    %11 = vector.load %arg2[%c0_17, %c0_18] : memref<128x128xbf16, #tpu.memory_space<vmem>>, vector<128x128xbf16>
    %cst_19 = arith.constant dense<0.000000e+00> : vector<64x128xf32>
    %12 = tpu.matmul %10, %11, %cst_19 {dimension_numbers = #tpu.dot_dimension_numbers<[1], [0], [0], [1], [0, 0, 1, 1], [], []>} : vector<64x128xbf16>, vector<128x128xbf16>, vector<64x128xf32> -> vector<64x128xf32>
    %c0_20 = arith.constant 0 : index
    %c0_21 = arith.constant 0 : index
    %13 = vector.load %arg3[%c0_20, %c0_21] : memref<1x128xf32, #tpu.memory_space<vmem>>, vector<1x128xf32>
    %14 = vector.broadcast %13 : vector<1x128xf32> to vector<64x128xf32>
    %15 = arith.addf %12, %14 : vector<64x128xf32>
    %cst_22 = arith.constant 0.000000e+00 : f32
    %16 = vector.broadcast %cst_22 : f32 to vector<64x128xf32>
    %17 = arith.maximumf %15, %16 : vector<64x128xf32>
    %18 = vector.shape_cast %17 : vector<64x128xf32> to vector<8x8x128xf32>
    %19 = arith.truncf %18 : vector<8x8x128xf32> to vector<8x8x128xbf16>
    %c1 = arith.constant 1 : index
    %c1_23 = arith.constant 1 : index
    %c0_24 = arith.constant 0 : index
    %20 = vector.load %arg9[%c1, %c1_23, %c0_24] : memref<10x10x128xbf16, #tpu.memory_space<vmem>>, vector<8x8x128xbf16>
    tpu.vector_store %arg9[%c1, %c1_23, %c0_24], %19 {strides = array<i32>} : memref<10x10x128xbf16, #tpu.memory_space<vmem>>, vector<8x8x128xbf16>,
    %c0_25 = arith.constant 0 : index
    %c0_26 = arith.constant 0 : index
    %c0_27 = arith.constant 0 : index
    %21 = vector.load %arg9[%c0_25, %c0_26, %c0_27] : memref<10x10x128xbf16, #tpu.memory_space<vmem>>, vector<8x8x128xbf16>
    %22 = vector.shape_cast %21 : vector<8x8x128xbf16> to vector<64x128xbf16>
    %c0_28 = arith.constant 0 : index
    %c0_29 = arith.constant 0 : index
    %c0_30 = arith.constant 0 : index
    %23 = vector.load %arg4[%c0_28, %c0_29, %c0_30] : memref<9x128x128xbf16, #tpu.memory_space<vmem>>, vector<1x128x128xbf16>
    %24 = vector.shape_cast %23 : vector<1x128x128xbf16> to vector<128x128xbf16>
    %cst_31 = arith.constant dense<0.000000e+00> : vector<64x128xf32>
    %25 = tpu.matmul %22, %24, %cst_31 {dimension_numbers = #tpu.dot_dimension_numbers<[1], [0], [0], [1], [0, 0, 1, 1], [], []>} : vector<64x128xbf16>, vector<128x128xbf16>, vector<64x128xf32> -> vector<64x128xf32>
    %c0_32 = arith.constant 0 : index
    %c0_33 = arith.constant 0 : index
    %26 = vector.load %arg10[%c0_32, %c0_33] : memref<64x128xf32, #tpu.memory_space<vmem>>, vector<64x128xf32>
    tpu.vector_store %arg10[%c0_32, %c0_33], %25 {strides = array<i32>} : memref<64x128xf32, #tpu.memory_space<vmem>>, vector<64x128xf32>,
    %c0_34 = arith.constant 0 : index
    %c1_35 = arith.constant 1 : index
    %c0_36 = arith.constant 0 : index
    %27 = vector.load %arg9[%c0_34, %c1_35, %c0_36] : memref<10x10x128xbf16, #tpu.memory_space<vmem>>, vector<8x8x128xbf16>
    %28 = vector.shape_cast %27 : vector<8x8x128xbf16> to vector<64x128xbf16>
    %c1_37 = arith.constant 1 : index
    %c0_38 = arith.constant 0 : index
    %c0_39 = arith.constant 0 : index
    %29 = vector.load %arg4[%c1_37, %c0_38, %c0_39] : memref<9x128x128xbf16, #tpu.memory_space<vmem>>, vector<1x128x128xbf16>
    %30 = vector.shape_cast %29 : vector<1x128x128xbf16> to vector<128x128xbf16>
    %cst_40 = arith.constant dense<0.000000e+00> : vector<64x128xf32>
    %31 = tpu.matmul %28, %30, %cst_40 {dimension_numbers = #tpu.dot_dimension_numbers<[1], [0], [0], [1], [0, 0, 1, 1], [], []>} : vector<64x128xbf16>, vector<128x128xbf16>, vector<64x128xf32> -> vector<64x128xf32>
    %c0_41 = arith.constant 0 : index
    %c0_42 = arith.constant 0 : index
    %32 = vector.load %arg10[%c0_41, %c0_42] : memref<64x128xf32, #tpu.memory_space<vmem>>, vector<64x128xf32>
    %33 = arith.addf %32, %31 : vector<64x128xf32>
    %c0_43 = arith.constant 0 : index
    %c0_44 = arith.constant 0 : index
    %34 = vector.load %arg10[%c0_43, %c0_44] : memref<64x128xf32, #tpu.memory_space<vmem>>, vector<64x128xf32>
    tpu.vector_store %arg10[%c0_43, %c0_44], %33 {strides = array<i32>} : memref<64x128xf32, #tpu.memory_space<vmem>>, vector<64x128xf32>,
    %c0_45 = arith.constant 0 : index
    %c2 = arith.constant 2 : index
    %c0_46 = arith.constant 0 : index
    %35 = vector.load %arg9[%c0_45, %c2, %c0_46] : memref<10x10x128xbf16, #tpu.memory_space<vmem>>, vector<8x8x128xbf16>
    %36 = vector.shape_cast %35 : vector<8x8x128xbf16> to vector<64x128xbf16>
    %c2_47 = arith.constant 2 : index
    %c0_48 = arith.constant 0 : index
    %c0_49 = arith.constant 0 : index
    %37 = vector.load %arg4[%c2_47, %c0_48, %c0_49] : memref<9x128x128xbf16, #tpu.memory_space<vmem>>, vector<1x128x128xbf16>
    %38 = vector.shape_cast %37 : vector<1x128x128xbf16> to vector<128x128xbf16>
    %cst_50 = arith.constant dense<0.000000e+00> : vector<64x128xf32>
    %39 = tpu.matmul %36, %38, %cst_50 {dimension_numbers = #tpu.dot_dimension_numbers<[1], [0], [0], [1], [0, 0, 1, 1], [], []>} : vector<64x128xbf16>, vector<128x128xbf16>, vector<64x128xf32> -> vector<64x128xf32>
    %c0_51 = arith.constant 0 : index
    %c0_52 = arith.constant 0 : index
    %40 = vector.load %arg10[%c0_51, %c0_52] : memref<64x128xf32, #tpu.memory_space<vmem>>, vector<64x128xf32>
    %41 = arith.addf %40, %39 : vector<64x128xf32>
    %c0_53 = arith.constant 0 : index
    %c0_54 = arith.constant 0 : index
    %42 = vector.load %arg10[%c0_53, %c0_54] : memref<64x128xf32, #tpu.memory_space<vmem>>, vector<64x128xf32>
    tpu.vector_store %arg10[%c0_53, %c0_54], %41 {strides = array<i32>} : memref<64x128xf32, #tpu.memory_space<vmem>>, vector<64x128xf32>,
    %c1_55 = arith.constant 1 : index
    %c0_56 = arith.constant 0 : index
    %c0_57 = arith.constant 0 : index
    %43 = vector.load %arg9[%c1_55, %c0_56, %c0_57] : memref<10x10x128xbf16, #tpu.memory_space<vmem>>, vector<8x8x128xbf16>
    %44 = vector.shape_cast %43 : vector<8x8x128xbf16> to vector<64x128xbf16>
    %c3 = arith.constant 3 : index
    %c0_58 = arith.constant 0 : index
    %c0_59 = arith.constant 0 : index
    %45 = vector.load %arg4[%c3, %c0_58, %c0_59] : memref<9x128x128xbf16, #tpu.memory_space<vmem>>, vector<1x128x128xbf16>
    %46 = vector.shape_cast %45 : vector<1x128x128xbf16> to vector<128x128xbf16>
    %cst_60 = arith.constant dense<0.000000e+00> : vector<64x128xf32>
    %47 = tpu.matmul %44, %46, %cst_60 {dimension_numbers = #tpu.dot_dimension_numbers<[1], [0], [0], [1], [0, 0, 1, 1], [], []>} : vector<64x128xbf16>, vector<128x128xbf16>, vector<64x128xf32> -> vector<64x128xf32>
    %c0_61 = arith.constant 0 : index
    %c0_62 = arith.constant 0 : index
    %48 = vector.load %arg10[%c0_61, %c0_62] : memref<64x128xf32, #tpu.memory_space<vmem>>, vector<64x128xf32>
    %49 = arith.addf %48, %47 : vector<64x128xf32>
    %c0_63 = arith.constant 0 : index
    %c0_64 = arith.constant 0 : index
    %50 = vector.load %arg10[%c0_63, %c0_64] : memref<64x128xf32, #tpu.memory_space<vmem>>, vector<64x128xf32>
    tpu.vector_store %arg10[%c0_63, %c0_64], %49 {strides = array<i32>} : memref<64x128xf32, #tpu.memory_space<vmem>>, vector<64x128xf32>,
    %c1_65 = arith.constant 1 : index
    %c1_66 = arith.constant 1 : index
    %c0_67 = arith.constant 0 : index
    %51 = vector.load %arg9[%c1_65, %c1_66, %c0_67] : memref<10x10x128xbf16, #tpu.memory_space<vmem>>, vector<8x8x128xbf16>
    %52 = vector.shape_cast %51 : vector<8x8x128xbf16> to vector<64x128xbf16>
    %c4 = arith.constant 4 : index
    %c0_68 = arith.constant 0 : index
    %c0_69 = arith.constant 0 : index
    %53 = vector.load %arg4[%c4, %c0_68, %c0_69] : memref<9x128x128xbf16, #tpu.memory_space<vmem>>, vector<1x128x128xbf16>
    %54 = vector.shape_cast %53 : vector<1x128x128xbf16> to vector<128x128xbf16>
    %cst_70 = arith.constant dense<0.000000e+00> : vector<64x128xf32>
    %55 = tpu.matmul %52, %54, %cst_70 {dimension_numbers = #tpu.dot_dimension_numbers<[1], [0], [0], [1], [0, 0, 1, 1], [], []>} : vector<64x128xbf16>, vector<128x128xbf16>, vector<64x128xf32> -> vector<64x128xf32>
    %c0_71 = arith.constant 0 : index
    %c0_72 = arith.constant 0 : index
    %56 = vector.load %arg10[%c0_71, %c0_72] : memref<64x128xf32, #tpu.memory_space<vmem>>, vector<64x128xf32>
    %57 = arith.addf %56, %55 : vector<64x128xf32>
    %c0_73 = arith.constant 0 : index
    %c0_74 = arith.constant 0 : index
    %58 = vector.load %arg10[%c0_73, %c0_74] : memref<64x128xf32, #tpu.memory_space<vmem>>, vector<64x128xf32>
    tpu.vector_store %arg10[%c0_73, %c0_74], %57 {strides = array<i32>} : memref<64x128xf32, #tpu.memory_space<vmem>>, vector<64x128xf32>,
    %c1_75 = arith.constant 1 : index
    %c2_76 = arith.constant 2 : index
    %c0_77 = arith.constant 0 : index
    %59 = vector.load %arg9[%c1_75, %c2_76, %c0_77] : memref<10x10x128xbf16, #tpu.memory_space<vmem>>, vector<8x8x128xbf16>
    %60 = vector.shape_cast %59 : vector<8x8x128xbf16> to vector<64x128xbf16>
    %c5 = arith.constant 5 : index
    %c0_78 = arith.constant 0 : index
    %c0_79 = arith.constant 0 : index
    %61 = vector.load %arg4[%c5, %c0_78, %c0_79] : memref<9x128x128xbf16, #tpu.memory_space<vmem>>, vector<1x128x128xbf16>
    %62 = vector.shape_cast %61 : vector<1x128x128xbf16> to vector<128x128xbf16>
    %cst_80 = arith.constant dense<0.000000e+00> : vector<64x128xf32>
    %63 = tpu.matmul %60, %62, %cst_80 {dimension_numbers = #tpu.dot_dimension_numbers<[1], [0], [0], [1], [0, 0, 1, 1], [], []>} : vector<64x128xbf16>, vector<128x128xbf16>, vector<64x128xf32> -> vector<64x128xf32>
    %c0_81 = arith.constant 0 : index
    %c0_82 = arith.constant 0 : index
    %64 = vector.load %arg10[%c0_81, %c0_82] : memref<64x128xf32, #tpu.memory_space<vmem>>, vector<64x128xf32>
    %65 = arith.addf %64, %63 : vector<64x128xf32>
    %c0_83 = arith.constant 0 : index
    %c0_84 = arith.constant 0 : index
    %66 = vector.load %arg10[%c0_83, %c0_84] : memref<64x128xf32, #tpu.memory_space<vmem>>, vector<64x128xf32>
    tpu.vector_store %arg10[%c0_83, %c0_84], %65 {strides = array<i32>} : memref<64x128xf32, #tpu.memory_space<vmem>>, vector<64x128xf32>,
    %c2_85 = arith.constant 2 : index
    %c0_86 = arith.constant 0 : index
    %c0_87 = arith.constant 0 : index
    %67 = vector.load %arg9[%c2_85, %c0_86, %c0_87] : memref<10x10x128xbf16, #tpu.memory_space<vmem>>, vector<8x8x128xbf16>
    %68 = vector.shape_cast %67 : vector<8x8x128xbf16> to vector<64x128xbf16>
    %c6 = arith.constant 6 : index
    %c0_88 = arith.constant 0 : index
    %c0_89 = arith.constant 0 : index
    %69 = vector.load %arg4[%c6, %c0_88, %c0_89] : memref<9x128x128xbf16, #tpu.memory_space<vmem>>, vector<1x128x128xbf16>
    %70 = vector.shape_cast %69 : vector<1x128x128xbf16> to vector<128x128xbf16>
    %cst_90 = arith.constant dense<0.000000e+00> : vector<64x128xf32>
    %71 = tpu.matmul %68, %70, %cst_90 {dimension_numbers = #tpu.dot_dimension_numbers<[1], [0], [0], [1], [0, 0, 1, 1], [], []>} : vector<64x128xbf16>, vector<128x128xbf16>, vector<64x128xf32> -> vector<64x128xf32>
    %c0_91 = arith.constant 0 : index
    %c0_92 = arith.constant 0 : index
    %72 = vector.load %arg10[%c0_91, %c0_92] : memref<64x128xf32, #tpu.memory_space<vmem>>, vector<64x128xf32>
    %73 = arith.addf %72, %71 : vector<64x128xf32>
    %c0_93 = arith.constant 0 : index
    %c0_94 = arith.constant 0 : index
    %74 = vector.load %arg10[%c0_93, %c0_94] : memref<64x128xf32, #tpu.memory_space<vmem>>, vector<64x128xf32>
    tpu.vector_store %arg10[%c0_93, %c0_94], %73 {strides = array<i32>} : memref<64x128xf32, #tpu.memory_space<vmem>>, vector<64x128xf32>,
    %c2_95 = arith.constant 2 : index
    %c1_96 = arith.constant 1 : index
    %c0_97 = arith.constant 0 : index
    %75 = vector.load %arg9[%c2_95, %c1_96, %c0_97] : memref<10x10x128xbf16, #tpu.memory_space<vmem>>, vector<8x8x128xbf16>
    %76 = vector.shape_cast %75 : vector<8x8x128xbf16> to vector<64x128xbf16>
    %c7 = arith.constant 7 : index
    %c0_98 = arith.constant 0 : index
    %c0_99 = arith.constant 0 : index
    %77 = vector.load %arg4[%c7, %c0_98, %c0_99] : memref<9x128x128xbf16, #tpu.memory_space<vmem>>, vector<1x128x128xbf16>
    %78 = vector.shape_cast %77 : vector<1x128x128xbf16> to vector<128x128xbf16>
    %cst_100 = arith.constant dense<0.000000e+00> : vector<64x128xf32>
    %79 = tpu.matmul %76, %78, %cst_100 {dimension_numbers = #tpu.dot_dimension_numbers<[1], [0], [0], [1], [0, 0, 1, 1], [], []>} : vector<64x128xbf16>, vector<128x128xbf16>, vector<64x128xf32> -> vector<64x128xf32>
    %c0_101 = arith.constant 0 : index
    %c0_102 = arith.constant 0 : index
    %80 = vector.load %arg10[%c0_101, %c0_102] : memref<64x128xf32, #tpu.memory_space<vmem>>, vector<64x128xf32>
    %81 = arith.addf %80, %79 : vector<64x128xf32>
    %c0_103 = arith.constant 0 : index
    %c0_104 = arith.constant 0 : index
    %82 = vector.load %arg10[%c0_103, %c0_104] : memref<64x128xf32, #tpu.memory_space<vmem>>, vector<64x128xf32>
    tpu.vector_store %arg10[%c0_103, %c0_104], %81 {strides = array<i32>} : memref<64x128xf32, #tpu.memory_space<vmem>>, vector<64x128xf32>,
    %c2_105 = arith.constant 2 : index
    %c2_106 = arith.constant 2 : index
    %c0_107 = arith.constant 0 : index
    %83 = vector.load %arg9[%c2_105, %c2_106, %c0_107] : memref<10x10x128xbf16, #tpu.memory_space<vmem>>, vector<8x8x128xbf16>
    %84 = vector.shape_cast %83 : vector<8x8x128xbf16> to vector<64x128xbf16>
    %c8 = arith.constant 8 : index
    %c0_108 = arith.constant 0 : index
    %c0_109 = arith.constant 0 : index
    %85 = vector.load %arg4[%c8, %c0_108, %c0_109] : memref<9x128x128xbf16, #tpu.memory_space<vmem>>, vector<1x128x128xbf16>
    %86 = vector.shape_cast %85 : vector<1x128x128xbf16> to vector<128x128xbf16>
    %cst_110 = arith.constant dense<0.000000e+00> : vector<64x128xf32>
    %87 = tpu.matmul %84, %86, %cst_110 {dimension_numbers = #tpu.dot_dimension_numbers<[1], [0], [0], [1], [0, 0, 1, 1], [], []>} : vector<64x128xbf16>, vector<128x128xbf16>, vector<64x128xf32> -> vector<64x128xf32>
    %c0_111 = arith.constant 0 : index
    %c0_112 = arith.constant 0 : index
    %88 = vector.load %arg10[%c0_111, %c0_112] : memref<64x128xf32, #tpu.memory_space<vmem>>, vector<64x128xf32>
    %89 = arith.addf %88, %87 : vector<64x128xf32>
    %c0_113 = arith.constant 0 : index
    %c0_114 = arith.constant 0 : index
    %90 = vector.load %arg10[%c0_113, %c0_114] : memref<64x128xf32, #tpu.memory_space<vmem>>, vector<64x128xf32>
    tpu.vector_store %arg10[%c0_113, %c0_114], %89 {strides = array<i32>} : memref<64x128xf32, #tpu.memory_space<vmem>>, vector<64x128xf32>,
    %c0_115 = arith.constant 0 : index
    %c0_116 = arith.constant 0 : index
    %91 = vector.load %arg10[%c0_115, %c0_116] : memref<64x128xf32, #tpu.memory_space<vmem>>, vector<64x128xf32>
    %c0_117 = arith.constant 0 : index
    %c0_118 = arith.constant 0 : index
    %92 = vector.load %arg5[%c0_117, %c0_118] : memref<1x128xf32, #tpu.memory_space<vmem>>, vector<1x128xf32>
    %93 = vector.broadcast %92 : vector<1x128xf32> to vector<64x128xf32>
    %94 = arith.addf %91, %93 : vector<64x128xf32>
    %cst_119 = arith.constant 0.000000e+00 : f32
    %95 = vector.broadcast %cst_119 : f32 to vector<64x128xf32>
    %96 = arith.maximumf %94, %95 : vector<64x128xf32>
    %97 = arith.truncf %96 : vector<64x128xf32> to vector<64x128xbf16>
    %c0_120 = arith.constant 0 : index
    %c0_121 = arith.constant 0 : index
    %98 = vector.load %arg6[%c0_120, %c0_121] : memref<128x128xbf16, #tpu.memory_space<vmem>>, vector<128x128xbf16>
    %cst_122 = arith.constant dense<0.000000e+00> : vector<64x128xf32>
    %99 = tpu.matmul %97, %98, %cst_122 {dimension_numbers = #tpu.dot_dimension_numbers<[1], [0], [0], [1], [0, 0, 1, 1], [], []>} : vector<64x128xbf16>, vector<128x128xbf16>, vector<64x128xf32> -> vector<64x128xf32>
    %c0_123 = arith.constant 0 : index
    %c0_124 = arith.constant 0 : index
    %100 = vector.load %arg7[%c0_123, %c0_124] : memref<1x128xf32, #tpu.memory_space<vmem>>, vector<1x128xf32>
    %101 = vector.broadcast %100 : vector<1x128xf32> to vector<64x128xf32>
    %102 = arith.addf %99, %101 : vector<64x128xf32>
    %103 = arith.extf %10 : vector<64x128xbf16> to vector<64x128xf32>
    %104 = arith.addf %102, %103 : vector<64x128xf32>
    %cst_125 = arith.constant 0.000000e+00 : f32
    %105 = vector.broadcast %cst_125 : f32 to vector<64x128xf32>
    %106 = arith.maximumf %104, %105 : vector<64x128xf32>
    %107 = vector.shape_cast %106 : vector<64x128xf32> to vector<8x8x128xf32>
    %108 = arith.truncf %107 : vector<8x8x128xf32> to vector<8x8x128xbf16>
    %c0_126 = arith.constant 0 : index
    %c0_127 = arith.constant 0 : index
    %c0_128 = arith.constant 0 : index
    %c0_129 = arith.constant 0 : index
    %109 = vector.load %arg8[%c0_126, %c0_127, %c0_128, %c0_129] : memref<1x8x8x128xbf16, #tpu.memory_space<vmem>>, vector<1x8x8x128xbf16>
    %110 = vector.shape_cast %109 : vector<1x8x8x128xbf16> to vector<8x8x128xbf16>
    %111 = vector.shape_cast %108 : vector<8x8x128xbf16> to vector<1x8x8x128xbf16>
    tpu.vector_store %arg8[%c0_126, %c0_127, %c0_128, %c0_129], %111 {strides = array<i32>} : memref<1x8x8x128xbf16, #tpu.memory_space<vmem>>, vector<1x8x8x128xbf16>,
    return
  }
  func.func @transform_0(%arg0: i32) -> (i32, i32, i32, i32) {
    %c0_i32 = arith.constant 0 : i32
    %c0_i32_0 = arith.constant 0 : i32
    %c0_i32_1 = arith.constant 0 : i32
    %c0_i32_2 = arith.constant 0 : i32
    return %arg0, %c0_i32, %c0_i32_0, %c0_i32_1 : i32, i32, i32, i32
  }
  func.func @transform_1(%arg0: i32) -> (i32, i32) {
    %c0_i32 = arith.constant 0 : i32
    %c0_i32_0 = arith.constant 0 : i32
    %c0_i32_1 = arith.constant 0 : i32
    return %c0_i32, %c0_i32_0 : i32, i32
  }
  func.func @transform_2(%arg0: i32) -> (i32, i32) {
    %c0_i32 = arith.constant 0 : i32
    %c0_i32_0 = arith.constant 0 : i32
    %c0_i32_1 = arith.constant 0 : i32
    return %c0_i32, %c0_i32_0 : i32, i32
  }
  func.func @transform_3(%arg0: i32) -> (i32, i32, i32) {
    %c0_i32 = arith.constant 0 : i32
    %c0_i32_0 = arith.constant 0 : i32
    %c0_i32_1 = arith.constant 0 : i32
    %c0_i32_2 = arith.constant 0 : i32
    return %c0_i32, %c0_i32_0, %c0_i32_1 : i32, i32, i32
  }
  func.func @transform_4(%arg0: i32) -> (i32, i32) {
    %c0_i32 = arith.constant 0 : i32
    %c0_i32_0 = arith.constant 0 : i32
    %c0_i32_1 = arith.constant 0 : i32
    return %c0_i32, %c0_i32_0 : i32, i32
  }
  func.func @transform_5(%arg0: i32) -> (i32, i32) {
    %c0_i32 = arith.constant 0 : i32
    %c0_i32_0 = arith.constant 0 : i32
    %c0_i32_1 = arith.constant 0 : i32
    return %c0_i32, %c0_i32_0 : i32, i32
  }
  func.func @transform_6(%arg0: i32) -> (i32, i32) {
    %c0_i32 = arith.constant 0 : i32
    %c0_i32_0 = arith.constant 0 : i32
    %c0_i32_1 = arith.constant 0 : i32
    return %c0_i32, %c0_i32_0 : i32, i32
  }
  func.func @transform_7(%arg0: i32) -> (i32, i32, i32, i32) {
    %c0_i32 = arith.constant 0 : i32
    %c0_i32_0 = arith.constant 0 : i32
    %c0_i32_1 = arith.constant 0 : i32
    %c0_i32_2 = arith.constant 0 : i32
    return %arg0, %c0_i32, %c0_i32_0, %c0_i32_1 : i32, i32, i32, i32
  }
}

</mosaic_0001>

<bundles_post_ra>
// kernel: tpu_custom_call.1
= control target key start
LH: loop header
LB: loop body
LE: loop exit
PB: predicated region body
PF: predicated region fallthrough
CT: control target
= control target key end

     0   :  { %s4815_s0 = inlined_call_operand.hbm [shape: bf16[2,8,8,128], index: 0, kind: input, shape index: {}]   ;;  %s4816_s1 = inlined_call_operand.hbm [shape: bf16[128,128], index: 1, kind: input, shape index: {}]   ;;  %s4817_s2 = inlined_call_operand.vmem [shape: f32[1,128], index: 2, kind: input, shape index: {}]   ;;  %s4818_s3 = inlined_call_operand.hbm [shape: bf16[9,128,128], index: 3, kind: input, shape index: {}]   ;;  %s4819_s4 = inlined_call_operand.vmem [shape: f32[1,128], index: 4, kind: input, shape index: {}]   ;;  %s4820_s5 = inlined_call_operand.hbm [shape: bf16[128,128], index: 5, kind: input, shape index: {}]   ;;  %s4821_s6 = inlined_call_operand.vmem [shape: f32[1,128], index: 6, kind: input, shape index: {}]   ;;  %s4822_s7 = inlined_call_operand.hbm [shape: bf16[2,8,8,128], index: 7, kind: output, shape index: {}]  }
   0x1   :  { %4829 = sst [smem:[#allocation25_spill]] %s4816_s1 }
   0x2   :  { %12 = vsyncpa [#allocation5], 0 }
   0x3   :  { %14 = vsyncpa [#allocation5 + $0x1], 0 }
   0x4   :  { %15 = vsyncpa [#allocation8], 0 }
   0x5   :  { %16 = vsyncpa [#allocation11], 0 }
   0x6   :  { %17 = vsyncpa [#allocation6], 0 }
   0x7   :  { %19 = vsyncpa [#allocation6 + $0x1], 0  ;;  %s4274_s24 = smov 0   ;;  %s4276_s25 = smov 0  }
   0x8   :  { %s4278_s26 = smov 0   ;;  %s4280_s27 = smov 0  }
   0x9 LB: > { %s4295_s28 = sadd.s32 4294967295, %s4222_s27   ;;  %s3222_s29 = sadd.s32 4294967294, %s4222_s27   ;;  %s4222_s27 = sphi %s4280_s27, %s4877_s27   ;;  %s4218_s26 = sphi %s4278_s26, %s4876_s26   ;;  %s4214_s25 = sphi %s4276_s25, %s4875_s25   ;;  %s4210_s24 = sphi %s4274_s24, %s4874_s24  }
   0xa   : > { %p45_p0 = scmp.ne.s32.totalorder %s4214_s25, %s4210_s24  ;;  %p4823_p1 = scmp.eq.s32.totalorder %s4295_s28, 0 }
   0xb   : > { %p195_p2 = scmp.eq.s32.totalorder %s4295_s28, 1  ;;  %p201_p3 = scmp.eq.s32.totalorder %s3222_s29, 1 }
   0xc   : > { %p4304_p4 = por %p4823_p1, %p45_p0  ;;  %p3223_p5 = scmp.ge.s32.totalorder %s4222_s27, 1 }
   0xd   : > { %p4309_p6 = por %p201_p3, %p45_p0  ;;  %p208_p7 = scmp.lt.s32.totalorder %s4222_s27, 3 }
   0xe   : > { %s4830_s30 = scalar_select %p4304_p4, 1, 0 }
   0xf   : > { %s4831_s8 = scalar_select %p4309_p6, 1, 0 }
  0x10   : > { %p4314_p8 = pnand %p3223_p5, %p208_p7  ;;  %s4224_s10 = smov [#allocation7]  }
  0x11   : > { %s220_s11 = sshll.u32 %s4224_s10, 4  ;;  %s4225_s13 = smov [#allocation9]   ;;  %s221_s11 = int_to_ptr.vmem [resolvable:$true] %s220_s11 }
  0x12   : > { %s4832_s9 = scalar_select %p4314_p8, 1, 0 }
  0x13   : > { %p3866_p9 = pneg %p4314_p8  ;;  %s236_s14 = sshll.u32 %s4225_s13, 4  ;;  %s237_s14 = int_to_ptr.vmem [resolvable:$true] %s236_s14 }
  0x14   : > { %s4226_s15 = smov [#allocation10]   ;;  %s4055_s17 = scalar_lea.vmem %s221_s11, 1024 }
  0x15   : > { %p4323_p11 = pnand %p3866_p9, %p4823_p1  ;;  %s252_s16 = sshll.u32 %s4226_s15, 4  ;;  %s253_s16 = int_to_ptr.vmem [resolvable:$true] %s252_s16 }
  0x16   : > { %p4056_p13 = scmp.ne.s32.totalorder %s221_s11, %s4055_s17  ;;  %p4063_p5 = scmp.lt.s32.totalorder %s221_s11, %s221_s11 }
  0x17   : > { %p4046_p12 = pneg %p4323_p11  ;;  %p4064_p7 = scmp.lt.s32.totalorder %s4055_s17, %s4055_s17 }
  0x19   : > { %p4058_p0 = pnand %p4056_p13, %p4046_p12  ;;  %p4065_p9 = por %p4064_p7, %p4063_p5 }
  0x1b   : > { %p4059_p3 = pneg %p4058_p0 }
  0x1d   : > { %p4066_p10 = pnand %p4065_p9, %p4059_p3 }
  0x1f   : > { %4069 = shalt.err (!%p4066_p10)
}
  0x20   : > { %s4824_s18 = smov 64   ;;  %s4825_s19 = smov 4  }
  0x21   : > { %s4834_s1 = sld [smem:[#allocation25_spill]]  ;;  %s4081_s22 = scalar_lea.vmem %s237_s14, 9216 }
  0x22   : > { %p4082_p13 = scmp.ne.s32.totalorder %s237_s14, %s4081_s22  ;;  %p4089_p3 = scmp.lt.s32.totalorder %s237_s14, %s237_s14 }
  0x23   : > { %p4090_p10 = scmp.lt.s32.totalorder %s4081_s22, %s4081_s22 }
  0x24   : > { %p4084_p0 = pnand %p4082_p13, %p4046_p12 }
  0x25   : > { %p4091_p7 = por %p4090_p10, %p4089_p3 }
  0x26   : > { %p4085_p5 = pneg %p4084_p0 }
  0x27   : > { %3869 = dma.hbm_to_vmem [thread:$0]  (!%p4323_p11), %s4834_s1, 1024, %s221_s11, [#allocation8], %s4824_s18, %s4824_s18, %s4825_s19  }
  0x28   : > { %p4092_p9 = pnand %p4091_p7, %p4085_p5 }
  0x2a   : > { %4095 = shalt.err (!%p4092_p9)
}
  0x2b   : > { %3872 = dma.hbm_to_vmem [thread:$0]  (!%p4323_p11), %s4818_s3, 9216, %s237_s14, [#allocation8], %s4824_s18, %s4824_s18, %s4825_s19  }
  0x2c   : > { %s4107_s10 = scalar_lea.vmem %s253_s16, 1024  ;;  %p4115_p3 = scmp.lt.s32.totalorder %s253_s16, %s253_s16 }
  0x2d   : > { %p4108_p1 = scmp.ne.s32.totalorder %s253_s16, %s4107_s10  ;;  %p4116_p5 = scmp.lt.s32.totalorder %s4107_s10, %s4107_s10 }
  0x2f   : > { %p4110_p13 = pnand %p4108_p1, %p4046_p12  ;;  %p4117_p10 = por %p4116_p5, %p4115_p3 }
  0x31   : > { %p4111_p0 = pneg %p4110_p13 }
  0x33   : > { %p4118_p7 = pnand %p4117_p10, %p4111_p0 }
  0x35   : > { %4121 = shalt.err (!%p4118_p7)
}
  0x36   : > { %3875 = dma.hbm_to_vmem [thread:$0]  (!%p4323_p11), %s4820_s5, 1024, %s253_s16, [#allocation11], %s4824_s18, %s4824_s18, %s4825_s19  }
  0x37   : > { %s4363_s14 = sadd.s32 1, %s4222_s27   ;;  %s32_s15 = sadd.s32 1, %s4218_s26 }
  0x38   : > { %s29_s12 = ssub.s32 %s4222_s27, %s4363_s14  ;;  %p39_p12 = scmp.ne.s32.totalorder %s4218_s26, %s4214_s25 }
  0x39   : > { %p30_p1 = scmp.eq.s32.totalorder %s29_s12, 0  ;;  %p40_p9 = scmp.eq.s32.totalorder %s4222_s27, 0 }
  0x3a   : > { %p3887_p13 = scmp.lt.s32.totalorder %s4222_s27, 2  ;;  %p4377_p3 = por %p195_p2, %p39_p12 }
  0x3b   : > { %s4373_s17 = scalar_select %p30_p1, %s4218_s26, %s32_s15  }
  0x3c   : > { %p41_p0 = por %p40_p9, %p39_p12  ;;  %s269_s21 = sand.u32 1, %s4218_s26  }
  0x3d   : > { %s4835_s20 = scalar_select %p4377_p3, 1, 0 }
  0x3e   : > { %s3405_s22 = sshll.u32 %s4222_s27, 9  ;;  %s3228_s16 = sshll.u32 %s269_s21, 5 }
  0x3f   : > { %s4386_s10 = scalar_lea.hbm %s4815_s0, %s3405_s22  ;;  %s273_s11 = scalar_lea.vmem [#allocation4], %s3228_s16 }
  0x40   : > { %s280_s13 = sshll.u32 %s273_s11, 4  ;;  %p4388_p11 = pnand %p3887_p13, %p41_p0  ;;  %s4392_s13 = int_to_ptr.vmem [resolvable:$true] %s280_s13 }
  0x41   : > { %s4394_s15 = scalar_lea.sflag [#allocation5], %s269_s21  ;;  %s4122_s18 = scalar_lea.hbm %s4386_s10, 512 }
  0x42   : > { %p4123_p2 = scmp.ne.s32.totalorder %s4386_s10, %s4122_s18  ;;  %p4124_p5 = pneg %p4388_p11 }
  0x43   : > { %s4127_s16 = scalar_lea.hbm %s4815_s0, 1024  ;;  %p4128_p1 = scmp.lt.s32.totalorder %s4386_s10, %s4815_s0 }
  0x44   : > { %p4125_p10 = pnand %p4124_p5, %p4123_p2  ;;  %p4129_p12 = scmp.lt.s32.totalorder %s4127_s16, %s4122_s18 }
  0x46   : > { %p4126_p7 = pneg %p4125_p10  ;;  %p4130_p9 = por %p4129_p12, %p4128_p1 }
  0x48   : > { %p4131_p13 = pnand %p4130_p9, %p4126_p7 }
  0x4a   : > { %4134 = shalt.err (!%p4131_p13)
}
  0x4b   : > { %s4135_s21 = scalar_lea.vmem %s4392_s13, 512  ;;  %s4229_s19 = smov [#allocation4]  }
  0x4c   : > { %p4136_p0 = scmp.ne.s32.totalorder %s4392_s13, %s4135_s21  ;;  %s4140_s1 = sshll.u32 %s4229_s19, 4  ;;  %s4141_s1 = int_to_ptr.vmem [resolvable:$false] %s4140_s1 }
  0x4d   : > { %s4142_s22 = scalar_lea.vmem %s4141_s1, 1024  ;;  %p4143_p10 = scmp.lt.s32.totalorder %s4392_s13, %s4141_s1 }
  0x4e   : > { %p4138_p6 = pnand %p4136_p0, %p4124_p5  ;;  %p4144_p3 = scmp.lt.s32.totalorder %s4142_s22, %s4135_s21 }
  0x50   : > { %p4139_p2 = pneg %p4138_p6  ;;  %p4145_p4 = por %p4144_p3, %p4143_p10 }
  0x52   : > { %p4146_p8 = pnand %p4145_p4, %p4139_p2 }
  0x54   : > { %4149 = shalt.err (!%p4146_p8)
}
  0x55   : > { %s4837_s18 = smov 4   ;;  %s4838_s23 = smov 64  }
  0x56   : > { %3879 = dma.hbm_to_vmem [thread:$0]  (!%p4388_p11), %s4386_s10, 512, %s4392_s13, %s4394_s15, %s4838_s23, %s4838_s23, %s4837_s18  }
  0x57   : > { %p4839_p6 = scmp.ne.s32.totalorder %s4832_s9, 0 }
  0x59   : > { %292 = sbr.rel (%p4839_p6) target bundleno = 925 (0x39d), region = 48 }
  0x5e   : > { %s4421_s19 = sand.u32 1, %s4214_s25   ;;  %p4840_p4 = scmp.ne.s32.totalorder %s4830_s30, 0 }
  0x5f   : > { %s3232_s1 = sshll.u32 %s4421_s19, 5  ;;  %s295_s16 = scalar_lea.sflag [#allocation5], %s4421_s19 }
  0x60   : > { %s4427_s12 = scalar_lea.vmem [#allocation4], %s3232_s1 }
  0x61   : > { %4193 = dma.done.wait (%p4840_p4), %s295_s16, 512  }
  0x62   : > { %4195 = vsyncadd (%p4840_p4), %s295_s16, 4294966784  ;;  %p4841_p8 = scmp.eq.s32.totalorder %s4295_s28, 0 }
  0x64   : > { %4197 = dma.done.wait (%p4841_p8), [#allocation8], 10240   ;;  %p4842_p3 = pmov %p4841_p8 }
  0x66   : > { %4199 = vsyncadd (%p4842_p3), [#allocation8], 4294957056  ;;  %p4843_p11 = pmov %p4842_p3 }
  0x67   : > { %p4844_p5 = pmov %p4842_p3 }
  0x68   : > { %4201 = dma.done.wait (%p4843_p11), [#allocation11], 1024  }
  0x69   : > { %4203 = vsyncadd (%p4844_p5), [#allocation11], 4294966272  ;;  %v3932_v0 = vld [vmem:[#allocation7 + $0x38] sm:$0xff]   ;;  %v3933_v1 = vld [vmem:[#allocation7 + $0x30] sm:$0xff]   ;;  %vm348_vm0 = vsmask.f32 256 }
  0x6a   : > { %3570 = vmatprep.subr.bf16.mxu0 %v3932_v0  ;;  %v3934_v2 = vld [vmem:[#allocation7 + $0x28] sm:$0xff]   ;;  %vm347_vm1 = vcmask 1040384   ;;  %vm380_vm2 = vsmask.f32 7938  ;;  %v3935_v4 = vld [vmem:[#allocation7 + $0x20] sm:$0xff]   ;;  %v3936_v7 = vld [vmem:[#allocation7 + $0x18] sm:$0xff]  }
  0x6b   : > { %3571 = vmatpush3.bf16.msra.mxu0 %v3932_v0  ;;  %vm4441_vm3 = vmand %vm347_vm1, %vm348_vm0  ;;  %v412_v5 = vld [vmem:[%s4427_s12] sm:$0xff]   ;;  %v3944_v8 = vld [vmem:[#allocation9 + $0x38] sm:$0xff]   ;;  %v4230_v34 = vmov 0   ;;  %vm701_vm5 = vcmask 1043456   ;;  %vm936_vm7 = vsmask.f32 3328 }
  0x6c   : > { %3572 = vmatprep.subr.bf16.mxu0 %v3933_v1  ;;  %vm4447_vm4 = vmand %vm347_vm1, %vm380_vm2  ;;  %v359_v9 = vld [vmem:[#allocation2 + $0x18] sm:$0x1]  ;;  %v391_v10 = vld [vmem:[#allocation2 + $0x1c] sm:$0x1]  ;;  %3586 = vmatprep.mubr.bf16.mxu0 %v412_v5  ;;  %342 = vst [vmem:[#allocation2] sm:$0xf] %v4230_v34 }
  0x6d   : > { %v360_v11 = vsel %vm4441_vm3, 0, %v359_v9  ;;  %v392_v12 = vsel %vm4447_vm4, 0, %v391_v10  ;;  %3594 = vmatprep.subr.bf16.mxu1 %v3944_v8  ;;  %v3937_v13 = vld [vmem:[#allocation7 + $0x10] sm:$0xff]   ;;  %v3938_v14 = vld [vmem:[#allocation7 + $0x8] sm:$0xff]   ;;  %v3939_v15 = vld [vmem:[#allocation7] sm:$0xff]   ;;  %vm1253_vm9 = vcmask 1042432  }
  0x6e   : > { %361 = vst [vmem:[#allocation2 + $0x18] sm:$0x1] %v360_v11  ;;  %393 = vst [vmem:[#allocation2 + $0x1c] sm:$0x1] %v392_v12  ;;  %3595 = vmatpush3.bf16.msra.mxu1 %v3944_v8  ;;  %v414_v16 = vld [vmem:[%s4427_s12 + $0x8] sm:$0xff]   ;;  %v416_v17 = vld [vmem:[%s4427_s12 + $0x10] sm:$0xff]  }
  0x6f   : > { %3573 = vmatpush3.bf16.msra.mxu0 %v3933_v1  ;;  %v418_v18 = vld [vmem:[%s4427_s12 + $0x18] sm:$0xff]   ;;  %v3945_v19 = vld [vmem:[#allocation9 + $0x30] sm:$0xff]   ;;  %v3946_v20 = vld [vmem:[#allocation9 + $0x28] sm:$0xff]   ;;  %343 = vst [vmem:[#allocation2 + $0x4] sm:$0x1] %v4230_v34  ;;  %vm1254_vm10 = vcmask 1046532  }
  0x70   : > { %3574 = vmatprep.subr.bf16.mxu0 %v3934_v2  ;;  %3596 = vmatprep.subr.bf16.mxu1 %v3945_v19  ;;  %v353_v21 = vld [vmem:[#allocation2 + $0x8] sm:$0x1]  ;;  %v385_v22 = vld [vmem:[#allocation2 + $0xc] sm:$0x1]  ;;  %v362_v26 = vld [vmem:[#allocation2 + $0x20] sm:$0x1] }
  0x71   : > { %v3947_v23 = vld [vmem:[#allocation9 + $0x78] sm:$0xff]   ;;  %v354_v24 = vsel %vm4441_vm3, 0, %v353_v21  ;;  %v386_v25 = vsel %vm4447_vm4, 0, %v385_v22  ;;  %v394_v27 = vld [vmem:[#allocation2 + $0x24] sm:$0x1]  ;;  %v3948_v28 = vld [vmem:[#allocation9 + $0x20] sm:$0xff]  }
  0x72   : > { %3597 = vmatpush3.bf16.msra.mxu1 %v3945_v19  ;;  %355 = vst [vmem:[#allocation2 + $0x8] sm:$0x1] %v354_v24  ;;  %387 = vst [vmem:[#allocation2 + $0xc] sm:$0x1] %v386_v25  ;;  %v363_v29 = vsel %vm4441_vm3, 0, %v362_v26  ;;  %v395_v30 = vsel %vm4447_vm4, 0, %v394_v27 }
  0x73   : > { %3575 = vmatpush3.bf16.msra.mxu0 %v3934_v2  ;;  %3598 = vmatprep.subr.bf16.mxu1 %v3946_v20  ;;  %364 = vst [vmem:[#allocation2 + $0x20] sm:$0x1] %v363_v29  ;;  %396 = vst [vmem:[#allocation2 + $0x24] sm:$0x1] %v395_v30  ;;  %v356_v31 = vld [vmem:[#allocation2 + $0x10] sm:$0x1] }
  0x74   : > { %3576 = vmatprep.subr.bf16.mxu0 %v3935_v4  ;;  %v388_v32 = vld [vmem:[#allocation2 + $0x14] sm:$0x1]  ;;  %v3949_v33 = vld [vmem:[#allocation9 + $0x70] sm:$0xff]   ;;  %346 = vst [vmem:[#allocation2 + $0x4c] sm:$0x1] %v4230_v34  ;;  %v357_v35 = vsel %vm4441_vm3, 0, %v356_v31  ;;  %vm4513_vm6 = vmand %vm701_vm5, %vm380_vm2 }
  0x75   : > { %345 = vst [vmem:[#allocation2 + $0x48] sm:$0xf] %v4230_v34  ;;  %v389_v36 = vsel %vm4447_vm4, 0, %v388_v32  ;;  %358 = vst [vmem:[#allocation2 + $0x10] sm:$0x1] %v357_v35  ;;  %v3950_v37 = vld [vmem:[#allocation9 + $0x18] sm:$0xff]  }
  0x76   : > { %3599 = vmatpush3.bf16.msra.mxu1 %v3946_v20  ;;  %390 = vst [vmem:[#allocation2 + $0x14] sm:$0x1] %v389_v36  ;;  %v365_v38 = vld [vmem:[#allocation2 + $0x28] sm:$0x1]  ;;  %v397_v40 = vld [vmem:[#allocation2 + $0x2c] sm:$0x1]  ;;  %vm4578_vm12 = vmor %vm1253_vm9, %vm1254_vm10 }
  0x77   : > { %3577 = vmatpush3.bf16.msra.mxu0 %v3935_v4  ;;  %3600 = vmatprep.subr.bf16.mxu1 %v3948_v28  ;;  %v366_v39 = vsel %vm4441_vm3, 0, %v365_v38  ;;  %v3951_v41 = vld [vmem:[#allocation9 + $0x68] sm:$0xff]   ;;  %v398_v42 = vsel %vm4447_vm4, 0, %v397_v40  ;;  %v3952_v43 = vld [vmem:[#allocation9 + $0x10] sm:$0xff]   ;;  %v3953_v49 = vld [vmem:[#allocation9 + $0x60] sm:$0xff]   ;;  %s340_s11 = scalar_lea.vmem [#allocation12], %s3232_s1 }
  0x78   : > { %3578 = vmatprep.subr.bf16.mxu0 %v3936_v7  ;;  %367 = vst [vmem:[#allocation2 + $0x28] sm:$0x1] %v366_v39  ;;  %399 = vst [vmem:[#allocation2 + $0x2c] sm:$0x1] %v398_v42  ;;  %v350_v44 = vld [vmem:[#allocation2] sm:$0x1] }
  0x79   : > { %v371_v45 = vld [vmem:[#allocation2 + $0x38] sm:$0x1]  ;;  %v351_v46 = vsel %vm4441_vm3, 0, %v350_v44  ;;  %v382_v47 = vld [vmem:[#allocation2 + $0x4] sm:$0x1]  ;;  %v3955_v57 = vld [vmem:[#allocation9 + $0x58] sm:$0xff]  }
  0x7a   : > { %3601 = vmatpush3.bf16.msra.mxu1 %v3948_v28  ;;  %v372_v48 = vsel %vm4441_vm3, 0, %v371_v45  ;;  %352 = vst [vmem:[#allocation2] sm:$0x1] %v351_v46  ;;  %v368_v50 = vld [vmem:[#allocation2 + $0x30] sm:$0x1]  ;;  %v383_v51 = vsel %vm4447_vm4, 0, %v382_v47 }
  0x7b   : > { %3579 = vmatpush3.bf16.msra.mxu0 %v3936_v7  ;;  %3602 = vmatprep.subr.bf16.mxu1 %v3950_v37  ;;  %373 = vst [vmem:[#allocation2 + $0x38] sm:$0x1] %v372_v48  ;;  %v403_v52 = vld [vmem:[#allocation2 + $0x3c] sm:$0x1]  ;;  %v369_v53 = vsel %vm4441_vm3, 0, %v368_v50  ;;  %v3956_v60 = vld [vmem:[#allocation9] sm:$0xff]  }
  0x7c   : > { %3580 = vmatprep.subr.bf16.mxu0 %v3937_v13  ;;  %v3954_v54 = vld [vmem:[#allocation9 + $0x8] sm:$0xff]   ;;  %384 = vst [vmem:[#allocation2 + $0x4] sm:$0x1] %v383_v51  ;;  %v404_v55 = vsel %vm4447_vm4, 0, %v403_v52  ;;  %370 = vst [vmem:[#allocation2 + $0x30] sm:$0x1] %v369_v53 }
  0x7d   : > { %405 = vst [vmem:[#allocation2 + $0x3c] sm:$0x1] %v404_v55  ;;  %v400_v56 = vld [vmem:[#allocation2 + $0x34] sm:$0x1]  ;;  %v374_v59 = vld [vmem:[#allocation2 + $0x40] sm:$0x1] }
  0x7e   : > { %3603 = vmatpush3.bf16.msra.mxu1 %v3950_v37  ;;  %v401_v58 = vsel %vm4447_vm4, 0, %v400_v56  ;;  %v375_v61 = vsel %vm4441_vm3, 0, %v374_v59  ;;  %v406_v62 = vld [vmem:[#allocation2 + $0x44] sm:$0x1]  ;;  %v4490_v1 = vld [vmem:[#allocation9 + $0xb8] sm:$0xff]   ;;  %v3961_v2 = vld [vmem:[#allocation9 + $0x48] sm:$0xff]  }
  0x7f   : > { %3581 = vmatpush3.bf16.msra.mxu0 %v3937_v13  ;;  %3604 = vmatprep.subr.bf16.mxu1 %v3952_v43  ;;  %402 = vst [vmem:[#allocation2 + $0x34] sm:$0x1] %v401_v58  ;;  %376 = vst [vmem:[#allocation2 + $0x40] sm:$0x1] %v375_v61  ;;  %v407_v63 = vsel %vm4447_vm4, 0, %v406_v62  ;;  %v3958_v0 = vld [vmem:[#allocation9 + $0x50] sm:$0xff]  }
  0x80   : > { %3582 = vmatprep.subr.bf16.mxu0 %v3938_v14  ;;  %408 = vst [vmem:[#allocation2 + $0x44] sm:$0x1] %v407_v63  ;;  %v3964_v4 = vld [vmem:[#allocation9 + $0x40] sm:$0xff]   ;;  %v4493_v5 = vld [vmem:[#allocation9 + $0xf8] sm:$0xff]   ;;  %v4503_v12 = vld [vmem:[%s4817_s2] ss:$0 sm:$0xff] }
  0x81   : > { %v377_v7 = vld [vmem:[#allocation2 + $0x48] sm:$0x1]  ;;  %v409_v9 = vld [vmem:[#allocation2 + $0x4c] sm:$0x1]  ;;  %v920_v11 = vld [vmem:[#allocation2] sm:$0xf] }
  0x82   : > { %3605 = vmatpush3.bf16.msra.mxu1 %v3952_v43  ;;  %v378_v8 = vsel %vm4441_vm3, 0, %v377_v7  ;;  %v410_v10 = vsel %vm4447_vm4, 0, %v409_v9  ;;  %v940_v13 = vshrl.u32 %v920_v11, 16  ;;  %v715_v36 = vld [vmem:[#allocation2 + $0x18] sm:$0xf]  ;;  %v4032_v3 = vld [vmem:[#allocation10 + $0x18] sm:$0xff]  }
  0x83   : > { %3583 = vmatpush3.bf16.msra.mxu0 %v3938_v14  ;;  %3606 = vmatprep.subr.bf16.mxu1 %v3954_v54  ;;  %379 = vst [vmem:[#allocation2 + $0x48] sm:$0x1] %v378_v8  ;;  %411 = vst [vmem:[#allocation2 + $0x4c] sm:$0x1] %v410_v10  ;;  %v943_v14 = vshll.u32 %v920_v11, 16  ;;  %s3120_s21 = sshll.u32 %s340_s11, 4  ;;  %s4767_s21 = int_to_ptr.vmem [resolvable:$true] %s3120_s21 }
  0x84   : > { %3584 = vmatprep.subr.bf16.mxu0 %v3939_v15  ;;  %v4508_v25 = vld [vmem:[#allocation2 + $0x4] sm:$0x1]  ;;  %v718_v40 = vld [vmem:[#allocation2 + $0x1c] sm:$0x1]  ;;  %v703_v50 = vld [vmem:[#allocation2 + $0x8] sm:$0xf] }
  0x85   : > { %v945_v19 = vrot.slane %v943_v14, 5  ;;  %v706_v51 = vld [vmem:[#allocation2 + $0xc] sm:$0x1]  ;;  %v721_v8 = vld [vmem:[#allocation2 + $0x20] sm:$0xf]  ;;  %s3414_s22 = sshll.u32 %s4295_s28, 9 }
  0x86   : > { %3607 = vmatpush3.bf16.msra.mxu1 %v3954_v54  ;;  %v724_v9 = vld [vmem:[#allocation2 + $0x24] sm:$0x1]  ;;  %vm937_vm8 = vsmask.f32 7440  ;;  %s4772_s1 = scalar_lea.hbm %s4822_s7, %s3414_s22  ;;  %s3107_s16 = scalar_lea.sflag [#allocation6], %s4421_s19 }
  0x87   : > { %3585 = vmatpush3.bf16.msra.mxu0 %v3939_v15  ;;  %3608 = vmatprep.subr.bf16.mxu1 %v3956_v60  ;;  %vm4563_vm11 = vmor %vm936_vm7, %vm937_vm8  ;;  %p4871_p1 = scmp.ne.s32.totalorder %s4835_s20, 0  ;;  %s4231_s28 = smov [#allocation12]  }
  0x88   : > { %3618 = vmatprep.subr.bf16.mxu0 %v3947_v23  ;;  %s4154_s30 = sshll.u32 %s4231_s28, 4  ;;  %s4155_s30 = int_to_ptr.vmem [resolvable:$false] %s4154_s30 }
  0x89   : > { %s4156_s9 = scalar_lea.vmem %s4155_s30, 1024  ;;  %p4157_p13 = scmp.lt.s32.totalorder %s4767_s21, %s4155_s30 }
  0x8a   : > { %3587 = vmatmul.mubr.bf16.vlgmr.msra.gmra.mxu0 %v414_v16  ;;  %3609 = vmatpush3.bf16.msra.mxu1 %v3956_v60 }
  0x8b   : > { %3590 = vmatprep.mubr.bf16.mxu0 %v416_v17  ;;  %3619 = vmatpush3.bf16.msra.mxu0 %v3947_v23 }
  0x8c   : > { %3620 = vmatprep.subr.bf16.mxu0 %v3949_v33  ;;  %3642 = vmatprep.subr.bf16.mxu1 %v4490_v1 }
  0x8f   : > { %3621 = vmatpush3.bf16.msra.mxu0 %v3949_v33  ;;  %v949_v33 = vshll.u32 %v4508_v25, 16 }
  0x90   : > { %3622 = vmatprep.subr.bf16.mxu0 %v3951_v41 }
  0x92   : > { %3591 = vmatmul.mubr.bf16.gmra.mxu0 %v418_v18  ;;  %v942_v18 = vrot.slane %v940_v13, 4 }
  0x93   : > { %3623 = vmatpush3.bf16.msra.mxu0 %v3951_v41 }
  0x94   : > { %3624 = vmatprep.subr.bf16.mxu0 %v3953_v49  ;;  %v946_v27 = vor.u32 %v945_v19, %v942_v18  ;;  %v712_v18 = vld [vmem:[#allocation2 + $0x14] sm:$0x1] }
  0x96   : > { %v4518_v45 = vrot.slane %v946_v27, 4  ;;  %v4535_v27 = vld [vmem:[#allocation2] sm:$0xe] }
  0x97   : > { %3625 = vmatpush3.bf16.msra.mxu0 %v3953_v49 }
  0x98   : > { %3626 = vmatprep.subr.bf16.mxu0 %v3955_v57 }
  0x9b   : > { %3627 = vmatpush3.bf16.msra.mxu0 %v3955_v57 }
  0x9c   : > { %3628 = vmatprep.subr.bf16.mxu0 %v3958_v0 }
  0x9f   : > { %3629 = vmatpush3.bf16.msra.mxu0 %v3958_v0 }
  0xa0   : > { %3630 = vmatprep.subr.bf16.mxu0 %v3961_v2 }
  0xa3   : > { %3631 = vmatpush3.bf16.msra.mxu0 %v3961_v2 }
  0xa4   : > { %3632 = vmatprep.subr.bf16.mxu0 %v3964_v4 }
  0xa7   : > { %3633 = vmatpush3.bf16.msra.mxu0 %v3964_v4 }
  0xa8   : > { %3666 = vmatprep.subr.bf16.mxu0 %v4493_v5 }
 0x14a   : > { %v3588_v15 = vpop.f32.mrf.mxu0 }
 0x14b   : > { %v558_v16 = vadd.f32 %v3588_v15, %v4503_v12 }
 0x14c   : > { %v549_v17 = vpop.f32.mrf.mxu0 }
 0x14d   : > { %v582_v20 = vmax.f32 %v558_v16, 0.0  ;;  %v550_v21 = vadd.f32 %v4503_v12, %v549_v17  ;;  %v709_v17 = vld [vmem:[#allocation2 + $0x10] sm:$0xf] }
 0x14e   : > { %v3589_v6 = vpop.f32.mrf.mxu0 }
 0x14f   : > { %v3408_v22 = vpack.c.bf16 %v582_v20, %v582_v20  ;;  %v580_v23 = vmax.f32 %v550_v21, 0.0  ;;  %v561_v24 = vadd.f32 %v3589_v6, %v4503_v12 }
 0x150   : > { %v552_v26 = vpop.f32.mrf.mxu0 }
 0x151   : > { %v637_v28 = vshrl.u32 %v3408_v22, 16  ;;  %v3406_v29 = vpack.c.bf16 %v580_v23, %v580_v23  ;;  %v583_v30 = vmax.f32 %v561_v24, 0.0  ;;  %v553_v31 = vadd.f32 %v4503_v12, %v552_v26 }
 0x152   : > { %v3592_v32 = vpop.f32.mrf.mxu0  ;;  %v640_v35 = vshll.u32 %v3408_v22, 16 }
 0x153   : > { %v639_v34 = vrot.slane %v637_v28, 7  ;;  %v621_v37 = vshrl.u32 %v3406_v29, 16  ;;  %v3409_v38 = vpack.c.bf16 %v583_v30, %v583_v30  ;;  %v624_v41 = vshll.u32 %v3406_v29, 16 }
 0x154   : > { %v581_v42 = vmax.f32 %v553_v31, 0.0  ;;  %v574_v43 = vadd.f32 %v3592_v32, %v4503_v12  ;;  %v565_v44 = vpop.f32.mrf.mxu0  ;;  %v4537_v32 = vld [vmem:[#allocation2 + $0x4] sm:$0x1] }
 0x155   : > { %v642_v46 = vor.u32 %v640_v35, %v639_v34  ;;  %v643_v47 = vrot.slane %v639_v34, 4  ;;  %v623_v48 = vrot.slane %v621_v37, 7  ;;  %v645_v49 = vshrl.u32 %v3409_v38, 16  ;;  %v739_v35 = vld [vmem:[#allocation2 + $0x38] sm:$0xf] }
 0x156   : > { %v648_v52 = vshll.u32 %v3409_v38, 16  ;;  %v3407_v53 = vpack.c.bf16 %v581_v42, %v581_v42  ;;  %v586_v54 = vmax.f32 %v574_v43, 0.0  ;;  %v566_v55 = vadd.f32 %v4503_v12, %v565_v44  ;;  %v3593_v56 = vpop.f32.mrf.mxu0  ;;  %v727_v37 = vld [vmem:[#allocation2 + $0x28] sm:$0xf]  ;;  %v730_v38 = vld [vmem:[#allocation2 + $0x2c] sm:$0x1] }
 0x157   : > { %v716_v57 = vsel %vm4513_vm6, %v642_v46, %v715_v36  ;;  %v719_v58 = vsel %vm4441_vm3, %v643_v47, %v718_v40  ;;  %v626_v59 = vor.u32 %v624_v41, %v623_v48  ;;  %v627_v60 = vrot.slane %v623_v48, 4  ;;  %v742_v36 = vld [vmem:[#allocation2 + $0x3c] sm:$0x1] }
 0x158   : > { %717 = vst [vmem:[#allocation2 + $0x18] sm:$0xf] %v716_v57  ;;  %720 = vst [vmem:[#allocation2 + $0x1c] sm:$0x1] %v719_v58  ;;  %v647_v61 = vrot.slane %v645_v49, 7  ;;  %v629_v62 = vshrl.u32 %v3407_v53, 16  ;;  %v3412_v0 = vpack.c.bf16 %v586_v54, %v586_v54  ;;  %v568_v2 = vpop.f32.mrf.mxu0  ;;  %v577_v11 = vadd.f32 %v3593_v56, %v4503_v12 }
 0x159   : > { %v632_v63 = vshll.u32 %v3407_v53, 16  ;;  %v704_v4 = vsel %vm4513_vm6, %v626_v59, %v703_v50  ;;  %v707_v7 = vsel %vm4441_vm3, %v627_v60, %v706_v51  ;;  %v584_v10 = vmax.f32 %v566_v55, 0.0  ;;  %v745_v54 = vld [vmem:[#allocation2 + $0x40] sm:$0xf] }
 0x15a   : > { %705 = vst [vmem:[#allocation2 + $0x8] sm:$0xf] %v704_v4  ;;  %708 = vst [vmem:[#allocation2 + $0xc] sm:$0x1] %v707_v7  ;;  %v650_v13 = vor.u32 %v648_v52, %v647_v61  ;;  %v651_v14 = vrot.slane %v647_v61, 4  ;;  %v631_v15 = vrot.slane %v629_v62, 7  ;;  %v569_v6 = vadd.f32 %v4503_v12, %v568_v2 }
 0x15b   : > { %v669_v16 = vshrl.u32 %v3412_v0, 16  ;;  %v672_v19 = vshll.u32 %v3412_v0, 16  ;;  %v3410_v20 = vpack.c.bf16 %v584_v10, %v584_v10  ;;  %v587_v21 = vmax.f32 %v577_v11, 0.0  ;;  %v733_v0 = vld [vmem:[#allocation2 + $0x30] sm:$0xf] }
 0x15c   : > { %v722_v22 = vsel %vm4513_vm6, %v650_v13, %v721_v8  ;;  %v725_v23 = vsel %vm4441_vm3, %v651_v14, %v724_v9  ;;  %v634_v24 = vor.u32 %v632_v63, %v631_v15  ;;  %v635_v26 = vrot.slane %v631_v15, 4  ;;  %v748_v63 = vld [vmem:[#allocation2 + $0x44] sm:$0x1]  ;;  %v736_v2 = vld [vmem:[#allocation2 + $0x34] sm:$0x1] }
 0x15d   : > { %723 = vst [vmem:[#allocation2 + $0x20] sm:$0xf] %v722_v22  ;;  %726 = vst [vmem:[#allocation2 + $0x24] sm:$0x1] %v725_v23  ;;  %v671_v28 = vrot.slane %v669_v16, 7  ;;  %v653_v29 = vshrl.u32 %v3410_v20, 16  ;;  %v3413_v31 = vpack.c.bf16 %v587_v21, %v587_v21 }
 0x15e   : > { %v656_v30 = vshll.u32 %v3410_v20, 16  ;;  %v710_v12 = vsel %vm4513_vm6, %v634_v24, %v709_v17  ;;  %v713_v34 = vsel %vm4441_vm3, %v635_v26, %v712_v18  ;;  %v585_v40 = vmax.f32 %v569_v6, 0.0  ;;  %v3962_v13 = vld [vmem:[#allocation9 + $0xb0] sm:$0xff]  }
 0x15f   : > { %v4545_v41 = vrot.slane %v949_v33, 5  ;;  %711 = vst [vmem:[#allocation2 + $0x10] sm:$0xf] %v710_v12  ;;  %714 = vst [vmem:[#allocation2 + $0x14] sm:$0x1] %v713_v34  ;;  %v674_v42 = vor.u32 %v672_v19, %v671_v28  ;;  %v675_v43 = vrot.slane %v671_v28, 4 }
 0x160   : > { %v655_v44 = vrot.slane %v653_v29, 7  ;;  %v677_v46 = vshrl.u32 %v3413_v31, 16  ;;  %v680_v47 = vshll.u32 %v3413_v31, 16  ;;  %v3411_v48 = vpack.c.bf16 %v585_v40, %v585_v40  ;;  %v926_v49 = vld [vmem:[#allocation2 + $0x18] sm:$0xf] }
 0x161   : > { %v3282_v50 = vrot.slane %v4535_v27, 9  ;;  %v1258_v51 = vrot.slane %v4537_v32, 5  ;;  %v740_v25 = vsel %vm4513_vm6, %v674_v42, %v739_v35  ;;  %v743_v33 = vsel %vm4441_vm3, %v675_v43, %v742_v36  ;;  %v3957_v55 = vld [vmem:[#allocation2] ss:$8 sps:$4 sm:$0xff]   ;;  %v923_v4 = vld [vmem:[#allocation2 + $0xc] sm:$0x1] }
 0x162   : > { %v658_v52 = vor.u32 %v656_v30, %v655_v44  ;;  %v659_v53 = vrot.slane %v655_v44, 4  ;;  %741 = vst [vmem:[#allocation2 + $0x38] sm:$0xf] %v740_v25  ;;  %744 = vst [vmem:[#allocation2 + $0x3c] sm:$0x1] %v743_v33  ;;  %v679_v56 = vrot.slane %v677_v46, 7  ;;  %3610 = vmatprep.mubr.bf16.mxu1 %v3957_v55  ;;  %v952_v29 = vsel %vm4563_vm11, %v4518_v45, %v4545_v41 }
 0x163   : > { %v661_v57 = vshrl.u32 %v3411_v48, 16  ;;  %v664_v58 = vshll.u32 %v3411_v48, 16  ;;  %v922_v59 = vld [vmem:[#allocation2 + $0x8] sm:$0xf]  ;;  %v982_v60 = vshrl.u32 %v926_v49, 16  ;;  %v963_v14 = vshll.u32 %v923_v4, 16 }
 0x164   : > { %v728_v61 = vsel %vm4513_vm6, %v658_v52, %v727_v37  ;;  %v731_v62 = vsel %vm4441_vm3, %v659_v53, %v730_v38  ;;  %v954_v7 = vshrl.u32 %v922_v59, 16  ;;  %v957_v8 = vshll.u32 %v922_v59, 16  ;;  %v927_v15 = vld [vmem:[#allocation2 + $0x1c] sm:$0x1]  ;;  %v1223_v20 = vld [vmem:[#allocation2 + $0x8] sm:$0xe] }
 0x165   : > { %729 = vst [vmem:[#allocation2 + $0x28] sm:$0xf] %v728_v61  ;;  %732 = vst [vmem:[#allocation2 + $0x2c] sm:$0x1] %v731_v62  ;;  %v682_v9 = vor.u32 %v680_v47, %v679_v56  ;;  %v683_v10 = vrot.slane %v679_v56, 4  ;;  %v663_v11 = vrot.slane %v661_v57, 7  ;;  %v1259_v33 = vsel %vm4578_vm12, %v3282_v50, %v1258_v51 }
 0x166   : > { %v956_v16 = vrot.slane %v954_v7, 4  ;;  %v959_v17 = vrot.slane %v957_v8, 5  ;;  %v984_v18 = vrot.slane %v982_v60, 4  ;;  %v985_v19 = vshll.u32 %v926_v49, 16  ;;  %v1224_v21 = vld [vmem:[#allocation2 + $0xc] sm:$0x1] }
 0x167   : > { %v746_v6 = vsel %vm4513_vm6, %v682_v9, %v745_v54  ;;  %v749_v22 = vsel %vm4441_vm3, %v683_v10, %v748_v63  ;;  %v666_v23 = vor.u32 %v664_v58, %v663_v11  ;;  %v667_v24 = vrot.slane %v663_v11, 4  ;;  %v3960_v26 = vld [vmem:[#allocation2 + $0x10] ss:$8 sps:$4 sm:$0xff]   ;;  %v925_v34 = vld [vmem:[#allocation2 + $0x14] sm:$0x1]  ;;  %v3969_v4 = vld [vmem:[#allocation9 + $0xf0] sm:$0xff]  }
 0x168   : > { %747 = vst [vmem:[#allocation2 + $0x40] sm:$0xf] %v746_v6  ;;  %750 = vst [vmem:[#allocation2 + $0x44] sm:$0x1] %v749_v22  ;;  %v960_v30 = vor.u32 %v959_v17, %v956_v16  ;;  %v965_v31 = vrot.slane %v963_v14, 5  ;;  %v987_v35 = vrot.slane %v985_v19, 5  ;;  %3611 = vmatmul.mubr.bf16.vlgmr.msra.gmra.mxu1 %v3960_v26 }
 0x169   : > { %v924_v12 = vld [vmem:[#allocation2 + $0x10] sm:$0xf]  ;;  %v734_v36 = vsel %vm4513_vm6, %v666_v23, %v733_v0  ;;  %v737_v37 = vsel %vm4441_vm3, %v667_v24, %v736_v2  ;;  %3643 = vmatpush3.bf16.msra.mxu1 %v4490_v1  ;;  %v3965_v45 = vld [vmem:[#allocation9 + $0xa8] sm:$0xff]   ;;  %v977_v41 = vshll.u32 %v925_v34, 16  ;;  %v991_v44 = vshll.u32 %v927_v15, 16  ;;  %v3970_v23 = vld [vmem:[#allocation9 + $0x98] sm:$0xff]  }
 0x16a   : > { %v968_v38 = vshrl.u32 %v924_v12, 16  ;;  %v971_v40 = vshll.u32 %v924_v12, 16  ;;  %735 = vst [vmem:[#allocation2 + $0x30] sm:$0xf] %v734_v36  ;;  %738 = vst [vmem:[#allocation2 + $0x34] sm:$0x1] %v737_v37  ;;  %v988_v43 = vor.u32 %v987_v35, %v984_v18  ;;  %3644 = vmatprep.subr.bf16.mxu1 %v3962_v13 }
 0x16b   : > { %v961_v42 = vrot.slane %v960_v30, 4  ;;  %v3283_v39 = vrot.slane %v1223_v20, 9  ;;  %v1262_v48 = vrot.slane %v1224_v21, 5  ;;  %v928_v49 = vld [vmem:[#allocation2 + $0x20] sm:$0xf]  ;;  %v979_v59 = vrot.slane %v977_v41, 5 }
 0x16c   : > { %v970_v46 = vrot.slane %v968_v38, 4  ;;  %v973_v47 = vrot.slane %v971_v40, 5  ;;  %v3963_v25 = vld [vmem:[#allocation2 + $0x20] ss:$8 sps:$4 sm:$0xff]   ;;  %v929_v52 = vld [vmem:[#allocation2 + $0x24] sm:$0x1] }
 0x16d   : > { %v966_v1 = vsel %vm4563_vm11, %v961_v42, %v965_v31  ;;  %v989_v55 = vrot.slane %v988_v43, 4  ;;  %v1263_v56 = vsel %vm4578_vm12, %v3283_v39, %v1262_v48  ;;  %v930_v57 = vld [vmem:[#allocation2 + $0x28] sm:$0xf]  ;;  %v931_v58 = vld [vmem:[#allocation2 + $0x2c] sm:$0x1]  ;;  %3614 = vmatprep.mubr.bf16.mxu1 %v3963_v25  ;;  %3645 = vmatpush3.bf16.msra.mxu1 %v3962_v13  ;;  %v993_v60 = vrot.slane %v991_v44, 5 }
 0x16e   : > { %v3270_v53 = vcombine.low %v952_v29, %v966_v1  ;;  %v974_v54 = vor.u32 %v973_v47, %v970_v46  ;;  %v996_v61 = vshrl.u32 %v928_v49, 16  ;;  %v999_v32 = vshll.u32 %v928_v49, 16  ;;  %v934_v62 = vld [vmem:[#allocation2 + $0x38] sm:$0xf]  ;;  %3646 = vmatprep.subr.bf16.mxu1 %v3965_v45  ;;  %v3968_v51 = vld [vmem:[#allocation9 + $0xa0] sm:$0xff]   ;;  %v3973_v46 = vld [vmem:[#allocation9 + $0x90] sm:$0xff]  }
 0x16f   : > { %v3290_v50 = vcombine.low %v1259_v33, %v1263_v56  ;;  %v1010_v63 = vshrl.u32 %v930_v57, 16  ;;  %v1013_v0 = vshll.u32 %v930_v57, 16  ;;  %v935_v2 = vld [vmem:[#allocation2 + $0x3c] sm:$0x1]  ;;  %v1005_v9 = vshll.u32 %v929_v52, 16  ;;  %v3974_v25 = vld [vmem:[#allocation9 + $0xe0] sm:$0xff]  }
 0x170   : > { %3634 = vmatprep.mubr.bf16.mxu0 %v3270_v53  ;;  %v975_v27 = vrot.slane %v974_v54, 4  ;;  %v998_v7 = vrot.slane %v996_v61, 4  ;;  %v1001_v8 = vrot.slane %v999_v32, 5  ;;  %v1019_v10 = vshll.u32 %v931_v58, 16  ;;  %v3971_v41 = vld [vmem:[#allocation9 + $0xe8] sm:$0xff]   ;;  %v3976_v56 = vld [vmem:[#allocation9 + $0xd8] sm:$0xff]  }
 0x171   : > { %v3966_v11 = vld [vmem:[#allocation2 + $0x30] ss:$8 sps:$4 sm:$0xff]   ;;  %v994_v14 = vsel %vm4563_vm11, %v989_v55, %v993_v60  ;;  %v1012_v15 = vrot.slane %v1010_v63, 4  ;;  %v1015_v16 = vrot.slane %v1013_v0, 5  ;;  %3647 = vmatpush3.bf16.msra.mxu1 %v3965_v45  ;;  %v933_v21 = vld [vmem:[#allocation2 + $0x34] sm:$0x1] }
 0x172   : > { %v980_v13 = vsel %vm4563_vm11, %v975_v27, %v979_v59  ;;  %v1002_v18 = vor.u32 %v1001_v8, %v998_v7  ;;  %v1021_v19 = vrot.slane %v1019_v10, 5  ;;  %v932_v20 = vld [vmem:[#allocation2 + $0x30] sm:$0xf]  ;;  %v1038_v6 = vshrl.u32 %v934_v62, 16  ;;  %3615 = vmatmul.mubr.bf16.gmra.mxu1 %v3966_v11  ;;  %3648 = vmatprep.subr.bf16.mxu1 %v3968_v51  ;;  %v1226_v33 = vld [vmem:[#allocation2 + $0x14] sm:$0x1] }
 0x173   : > { %v3271_v17 = vcombine.low %v980_v13, %v994_v14  ;;  %v1016_v22 = vor.u32 %v1015_v16, %v1012_v15  ;;  %v1024_v24 = vshrl.u32 %v932_v20, 16  ;;  %v1027_v26 = vshll.u32 %v932_v20, 16  ;;  %3658 = vmatprep.mubr.bf16.mxu1 %v3290_v50  ;;  %v1225_v1 = vld [vmem:[#allocation2 + $0x10] sm:$0xe]  ;;  %v3975_v53 = vld [vmem:[#allocation9 + $0x88] sm:$0xff]   ;;  %v3978_v14 = vld [vmem:[#allocation9 + $0xd0] sm:$0xff]  }
 0x174   : > { %v1033_v29 = vshll.u32 %v933_v21, 16  ;;  %v1003_v30 = vrot.slane %v1002_v18, 4  ;;  %v1040_v31 = vrot.slane %v1038_v6, 4  ;;  %v1041_v12 = vshll.u32 %v934_v62, 16  ;;  %v3972_v55 = vld [vmem:[#allocation2 + $0x8] ss:$8 sps:$4 sm:$0xff]  }
 0x175   : > { %3635 = vmatmul.mubr.bf16.vlgmr.msra.gmra.mxu0 %v3271_v17  ;;  %v1047_v34 = vshll.u32 %v935_v2, 16  ;;  %v1007_v35 = vrot.slane %v1005_v9, 5  ;;  %v1017_v36 = vrot.slane %v1016_v22, 4  ;;  %v1026_v37 = vrot.slane %v1024_v24, 4  ;;  %3649 = vmatpush3.bf16.msra.mxu1 %v3968_v51  ;;  %v1227_v57 = vld [vmem:[#allocation2 + $0x18] sm:$0xe] }
 0x176   : > { %3667 = vmatpush3.bf16.msra.mxu0 %v4493_v5  ;;  %v1029_v38 = vrot.slane %v1027_v26, 5  ;;  %v1043_v40 = vrot.slane %v1041_v12, 5  ;;  %3650 = vmatprep.subr.bf16.mxu1 %v3970_v23  ;;  %v1035_v44 = vrot.slane %v1033_v29, 5  ;;  %v3977_v59 = vld [vmem:[#allocation9 + $0x80] sm:$0xff]   ;;  %v1228_v60 = vld [vmem:[#allocation2 + $0x1c] sm:$0x1] }
 0x177   : > { %3668 = vmatprep.subr.bf16.mxu0 %v3969_v4  ;;  %v1008_v42 = vsel %vm4563_vm11, %v1003_v30, %v1007_v35  ;;  %v1022_v45 = vsel %vm4563_vm11, %v1017_v36, %v1021_v19  ;;  %v1049_v39 = vrot.slane %v1047_v34, 5  ;;  %v3284_v61 = vrot.slane %v1225_v1, 9  ;;  %v1644_v62 = vld [vmem:[#allocation2 + $0x8] sm:$0xf]  ;;  %v1232_v50 = vld [vmem:[#allocation2 + $0x2c] sm:$0x1] }
 0x178   : > { %v1030_v43 = vor.u32 %v1029_v38, %v1026_v37  ;;  %v3272_v47 = vcombine.low %v1008_v42, %v1022_v45  ;;  %v1044_v5 = vor.u32 %v1043_v40, %v1040_v31  ;;  %v1266_v32 = vrot.slane %v1226_v33, 5  ;;  %v1231_v27 = vld [vmem:[#allocation2 + $0x28] sm:$0xe]  ;;  %v1646_v51 = vld [vmem:[#allocation2 + $0x10] sm:$0xf]  ;;  %v3980_v35 = vld [vmem:[#allocation9 + $0xc8] sm:$0xff]  }
 0x179   : > { %3651 = vmatpush3.bf16.msra.mxu1 %v3970_v23  ;;  %v1229_v63 = vld [vmem:[#allocation2 + $0x20] sm:$0xe]  ;;  %v1661_v0 = vshrl.u32 %v1644_v62, 16  ;;  %v1664_v2 = vshll.u32 %v1644_v62, 16  ;;  %v1675_v7 = vshrl.u32 %v1646_v51, 16  ;;  %v1678_v8 = vshll.u32 %v1646_v51, 16 }
 0x17a   : > { %3669 = vmatpush3.bf16.msra.mxu0 %v3969_v4  ;;  %v1031_v48 = vrot.slane %v1030_v43, 4  ;;  %3638 = vmatprep.mubr.bf16.mxu0 %v3272_v47  ;;  %v1045_v49 = vrot.slane %v1044_v5, 4  ;;  %v1230_v4 = vld [vmem:[#allocation2 + $0x24] sm:$0x1]  ;;  %v3285_v9 = vrot.slane %v1227_v57, 9  ;;  %v1270_v10 = vrot.slane %v1228_v60, 5 }
 0x17b   : > { %3670 = vmatprep.subr.bf16.mxu0 %v3971_v41  ;;  %3652 = vmatprep.subr.bf16.mxu1 %v3973_v46  ;;  %v3287_v11 = vrot.slane %v1231_v27, 9  ;;  %v1278_v13 = vrot.slane %v1232_v50, 5  ;;  %v1267_v15 = vsel %vm4578_vm12, %v3284_v61, %v1266_v32  ;;  %v3979_v16 = vld [vmem:[#allocation9 + $0x138] sm:$0xff]   ;;  %v1677_v17 = vrot.slane %v1675_v7, 4  ;;  %v1233_v22 = vld [vmem:[#allocation2 + $0x30] sm:$0xe] }
 0x17c   : > { %v1036_v52 = vsel %vm4563_vm11, %v1031_v48, %v1035_v44  ;;  %v1050_v54 = vsel %vm4563_vm11, %v1045_v49, %v1049_v39  ;;  %v1680_v18 = vrot.slane %v1678_v8, 5  ;;  %v3286_v19 = vrot.slane %v1229_v63, 9  ;;  %v1647_v23 = vld [vmem:[#allocation2 + $0x14] sm:$0x1]  ;;  %v1235_v30 = vld [vmem:[#allocation2 + $0x38] sm:$0xe] }
 0x17d   : > { %v3273_v58 = vcombine.low %v1036_v52, %v1050_v54  ;;  %3653 = vmatpush3.bf16.msra.mxu1 %v3973_v46  ;;  %v1274_v20 = vrot.slane %v1230_v4, 5  ;;  %v1663_v21 = vrot.slane %v1661_v0, 4  ;;  %v1666_v6 = vrot.slane %v1664_v2, 5  ;;  %v1234_v29 = vld [vmem:[#allocation2 + $0x34] sm:$0x1]  ;;  %v3983_v33 = vld [vmem:[#allocation9 + $0x128] sm:$0xff]  }
 0x17e   : > { %3671 = vmatpush3.bf16.msra.mxu0 %v3971_v41  ;;  %3654 = vmatprep.subr.bf16.mxu1 %v3975_v53  ;;  %v1271_v24 = vsel %vm4578_vm12, %v3285_v9, %v1270_v10  ;;  %v1279_v26 = vsel %vm4578_vm12, %v3287_v11, %v1278_v13  ;;  %v1236_v31 = vld [vmem:[#allocation2 + $0x3c] sm:$0x1]  ;;  %v1681_v12 = vor.u32 %v1680_v18, %v1677_v17  ;;  %v1645_v36 = vld [vmem:[#allocation2 + $0xc] sm:$0x1]  ;;  %v3288_v38 = vrot.slane %v1233_v22, 9  ;;  %v3981_v41 = vld [vmem:[#allocation9 + $0x130] sm:$0xff]  }
 0x17f   : > { %3672 = vmatprep.subr.bf16.mxu0 %v3974_v25  ;;  %3639 = vmatmul.mubr.bf16.gmra.mxu0 %v3273_v58  ;;  %v3291_v34 = vcombine.low %v1267_v15, %v1271_v24  ;;  %v1275_v37 = vsel %vm4578_vm12, %v3286_v19, %v1274_v20  ;;  %v1667_v40 = vor.u32 %v1666_v6, %v1663_v21  ;;  %v1684_v42 = vshll.u32 %v1647_v23, 16  ;;  %v3982_v39 = vld [vmem:[#allocation9 + $0xc0] sm:$0xff]   ;;  %v3985_v54 = vld [vmem:[#allocation9 + $0x178] sm:$0xff]   ;;  %v3984_v58 = vld [vmem:[#allocation2 + $0x18] ss:$8 sps:$4 sm:$0xff]  }
 0x180   : > { %3682 = vmatprep.mubr.bf16.mxu0 %v3972_v55  ;;  %v3292_v45 = vcombine.low %v1275_v37, %v1279_v26  ;;  %v1282_v43 = vrot.slane %v1234_v29, 5  ;;  %v3289_v44 = vrot.slane %v1235_v30, 9  ;;  %v1286_v46 = vrot.slane %v1236_v31, 5  ;;  %v3987_v57 = vld [vmem:[#allocation9 + $0x120] sm:$0xff]   ;;  %v3988_v60 = vld [vmem:[#allocation9 + $0x170] sm:$0xff]   ;;  %v3989_v4 = vld [vmem:[#allocation9 + $0x118] sm:$0xff]  }
 0x181   : > { %3655 = vmatpush3.bf16.msra.mxu1 %v3975_v53  ;;  %v1670_v47 = vshll.u32 %v1645_v36, 16  ;;  %v1682_v5 = vrot.slane %v1681_v12, 4  ;;  %v1668_v48 = vrot.slane %v1667_v40, 4  ;;  %v1686_v49 = vrot.slane %v1684_v42, 5  ;;  %v1944_v61 = vld [vmem:[#allocation2 + $0x10] sm:$0xe] }
 0x182   : > { %3673 = vmatpush3.bf16.msra.mxu0 %v3974_v25  ;;  %3656 = vmatprep.subr.bf16.mxu1 %v3977_v59  ;;  %v1283_v25 = vsel %vm4578_vm12, %v3288_v38, %v1282_v43  ;;  %v1287_v1 = vsel %vm4578_vm12, %v3289_v44, %v1286_v46  ;;  %v1945_v32 = vld [vmem:[#allocation2 + $0x14] sm:$0x1]  ;;  %v1650_v62 = vld [vmem:[#allocation2 + $0x20] sm:$0xf]  ;;  %v1942_v27 = vld [vmem:[#allocation2 + $0x8] sm:$0xe] }
 0x183   : > { %3674 = vmatprep.subr.bf16.mxu0 %v3976_v56  ;;  %v1672_v52 = vrot.slane %v1670_v47, 5  ;;  %v1687_v53 = vsel %vm4563_vm11, %v1682_v5, %v1686_v49  ;;  %v3293_v55 = vcombine.low %v1283_v25, %v1287_v1  ;;  %v1943_v50 = vld [vmem:[#allocation2 + $0xc] sm:$0x1]  ;;  %v1648_v51 = vld [vmem:[#allocation2 + $0x18] sm:$0xf]  ;;  %v3327_v7 = vrot.slane %v1944_v61, 9 }
 0x184   : > { %v3986_v63 = vld [vmem:[#allocation2 + $0x28] ss:$8 sps:$4 sm:$0xff]   ;;  %v1980_v8 = vrot.slane %v1945_v32, 5  ;;  %v1703_v9 = vshrl.u32 %v1650_v62, 16  ;;  %v1706_v10 = vshll.u32 %v1650_v62, 16  ;;  %v3326_v11 = vrot.slane %v1942_v27, 9 }
 0x185   : > { %3657 = vmatpush3.bf16.msra.mxu1 %v3977_v59  ;;  %v1652_v0 = vld [vmem:[#allocation2 + $0x28] sm:$0xf]  ;;  %v1654_v2 = vld [vmem:[#allocation2 + $0x30] sm:$0xf]  ;;  %v1976_v13 = vrot.slane %v1943_v50, 5  ;;  %v1692_v15 = vshll.u32 %v1648_v51, 16 }
 0x186   : > { %3675 = vmatpush3.bf16.msra.mxu0 %v3976_v56  ;;  %3690 = vmatprep.subr.bf16.mxu1 %v3979_v16  ;;  %v1673_v56 = vsel %vm4563_vm11, %v1668_v48, %v1672_v52  ;;  %v1717_v17 = vshrl.u32 %v1652_v0, 16  ;;  %v1720_v18 = vshll.u32 %v1652_v0, 16  ;;  %v1731_v19 = vshrl.u32 %v1654_v2, 16  ;;  %v3990_v21 = vld [vmem:[#allocation2 + $0x38] ss:$8 sps:$4 sm:$0xff]   ;;  %v3993_v23 = vld [vmem:[#allocation9 + $0x160] sm:$0xff]  }
 0x187   : > { %3676 = vmatprep.subr.bf16.mxu0 %v3978_v14  ;;  %v3314_v59 = vcombine.low %v1673_v56, %v1687_v53  ;;  %v1734_v20 = vshll.u32 %v1654_v2, 16  ;;  %v1981_v6 = vsel %vm4578_vm12, %v3327_v7, %v1980_v8  ;;  %v3992_v22 = vld [vmem:[#allocation9 + $0x110] sm:$0xff]   ;;  %v1705_v24 = vrot.slane %v1703_v9, 4  ;;  %v1653_v12 = vld [vmem:[#allocation2 + $0x2c] sm:$0x1] }
 0x188   : > { %3659 = vmatmul.mubr.bf16.vlgmr.msra.gmra.mxu1 %v3291_v34  ;;  %v1708_v26 = vrot.slane %v1706_v10, 5  ;;  %v1977_v29 = vsel %vm4578_vm12, %v3326_v11, %v1976_v13  ;;  %v1694_v31 = vrot.slane %v1692_v15, 5  ;;  %v1656_v34 = vld [vmem:[#allocation2 + $0x38] sm:$0xf]  ;;  %v1722_v36 = vrot.slane %v1720_v18, 5  ;;  %v3995_v49 = vld [vmem:[#allocation9 + $0x158] sm:$0xff]  }
 0x189   : > { %3662 = vmatprep.mubr.bf16.mxu1 %v3292_v45  ;;  %3691 = vmatpush3.bf16.msra.mxu1 %v3979_v16  ;;  %v3991_v16 = vld [vmem:[#allocation9 + $0x168] sm:$0xff]   ;;  %v1733_v37 = vrot.slane %v1731_v19, 4  ;;  %v1736_v38 = vrot.slane %v1734_v20, 5  ;;  %v1658_v40 = vld [vmem:[#allocation2 + $0x40] sm:$0xf]  ;;  %v3334_v42 = vcombine.low %v1977_v29, %v1981_v6  ;;  %v1745_v47 = vshrl.u32 %v1656_v34, 16 }
 0x18a   : > { %3677 = vmatpush3.bf16.msra.mxu0 %v3978_v14  ;;  %3692 = vmatprep.subr.bf16.mxu1 %v3981_v41  ;;  %v1689_v14 = vshrl.u32 %v1648_v51, 16  ;;  %v1655_v45 = vld [vmem:[#allocation2 + $0x34] sm:$0x1]  ;;  %v1649_v43 = vld [vmem:[#allocation2 + $0x1c] sm:$0x1]  ;;  %v1709_v46 = vor.u32 %v1708_v26, %v1705_v24  ;;  %v1748_v5 = vshll.u32 %v1656_v34, 16 }
 0x18b   : > { %3678 = vmatprep.subr.bf16.mxu0 %v3980_v35  ;;  %v1651_v44 = vld [vmem:[#allocation2 + $0x24] sm:$0x1]  ;;  %v1762_v48 = vshll.u32 %v1658_v40, 16  ;;  %v1726_v1 = vshll.u32 %v1653_v12, 16  ;;  %v1740_v52 = vshll.u32 %v1655_v45, 16  ;;  %v1698_v56 = vshll.u32 %v1649_v43, 16 }
 0x18c   : > { %v1691_v30 = vrot.slane %v1689_v14, 4  ;;  %v1750_v61 = vrot.slane %v1748_v5, 5  ;;  %v1659_v0 = vld [vmem:[#allocation2 + $0x44] sm:$0x1]  ;;  %v3998_v9 = vld [vmem:[#allocation9 + $0x1b8] sm:$0xff]   ;;  %v3999_v18 = vld [vmem:[#allocation9 + $0x148] sm:$0xff]  }
 0x18d   : > { %3693 = vmatpush3.bf16.msra.mxu1 %v3981_v41  ;;  %v3994_v41 = vld [vmem:[#allocation9 + $0x108] sm:$0xff]   ;;  %v1764_v62 = vrot.slane %v1762_v48, 5  ;;  %v1728_v50 = vrot.slane %v1726_v1, 5  ;;  %v1700_v8 = vrot.slane %v1698_v56, 5  ;;  %v1768_v14 = vshll.u32 %v1659_v0, 16  ;;  %v4000_v6 = vld [vmem:[#allocation9 + $0x1b0] sm:$0xff]  }
 0x18e   : > { %3679 = vmatpush3.bf16.msra.mxu0 %v3980_v35  ;;  %3694 = vmatprep.subr.bf16.mxu1 %v3983_v33  ;;  %v1719_v35 = vrot.slane %v1717_v17, 4  ;;  %v1695_v53 = vor.u32 %v1694_v31, %v1691_v30  ;;  %v2363_v15 = vld [vmem:[#allocation2 + $0x10] sm:$0xf]  ;;  %v1948_v19 = vld [vmem:[#allocation2 + $0x20] sm:$0xe] }
 0x18f   : > { %3680 = vmatprep.subr.bf16.mxu0 %v3982_v39  ;;  %v1949_v20 = vld [vmem:[#allocation2 + $0x24] sm:$0x1]  ;;  %v2365_v24 = vld [vmem:[#allocation2 + $0x18] sm:$0xf]  ;;  %v1951_v29 = vld [vmem:[#allocation2 + $0x2c] sm:$0x1] }
 0x190   : > { %3663 = vmatmul.mubr.bf16.gmra.mxu1 %v3293_v55  ;;  %v1723_v25 = vor.u32 %v1722_v36, %v1719_v35  ;;  %v3996_v55 = vld [vmem:[#allocation9 + $0x100] sm:$0xff]   ;;  %v1696_v2 = vrot.slane %v1695_v53, 4  ;;  %v2380_v31 = vshrl.u32 %v2363_v15, 16  ;;  %v2383_v12 = vshll.u32 %v2363_v15, 16  ;;  %v1947_v45 = vld [vmem:[#allocation2 + $0x1c] sm:$0x1] }
 0x191   : > { %3706 = vmatprep.mubr.bf16.mxu1 %v3314_v59  ;;  %3695 = vmatpush3.bf16.msra.mxu1 %v3983_v33  ;;  %v1737_v33 = vor.u32 %v1736_v38, %v1733_v37  ;;  %v3997_v59 = vld [vmem:[#allocation9 + $0x150] sm:$0xff]   ;;  %v1952_v30 = vld [vmem:[#allocation2 + $0x30] sm:$0xe]  ;;  %v1770_v38 = vrot.slane %v1768_v14, 5  ;;  %v2397_v43 = vshll.u32 %v2365_v24, 16  ;;  %v1992_v5 = vrot.slane %v1951_v29, 5 }
 0x192   : > { %3681 = vmatpush3.bf16.msra.mxu0 %v3982_v39  ;;  %3696 = vmatprep.subr.bf16.mxu1 %v3987_v57  ;;  %v1759_v39 = vshrl.u32 %v1658_v40, 16  ;;  %v1724_v27 = vrot.slane %v1723_v25, 4  ;;  %v4001_v35 = vld [vmem:[#allocation9 + $0x140] sm:$0xff]   ;;  %v3331_v48 = vrot.slane %v1952_v30, 9  ;;  %v2382_v25 = vrot.slane %v2380_v31, 4  ;;  %v4009_v30 = vld [vmem:[#allocation9 + $0x190] sm:$0xff]  }
 0x193   : > { %3714 = vmatprep.subr.bf16.mxu0 %v3985_v54  ;;  %v1738_v51 = vrot.slane %v1737_v33, 4  ;;  %v1953_v40 = vld [vmem:[#allocation2 + $0x34] sm:$0x1]  ;;  %v2385_v1 = vrot.slane %v2383_v12, 5 }
 0x194   : > { %v1761_v32 = vrot.slane %v1759_v39, 4  ;;  %v4002_v39 = vld [vmem:[#allocation9 + $0x1a8] sm:$0xff]  }
 0x195   : > { %3683 = vmatmul.mubr.bf16.vlgmr.msra.gmra.mxu0 %v3984_v58  ;;  %3697 = vmatpush3.bf16.msra.mxu1 %v3987_v57  ;;  %v1710_v57 = vrot.slane %v1709_v46, 4  ;;  %v1657_v58 = vld [vmem:[#allocation2 + $0x3c] sm:$0x1]  ;;  %v1988_v46 = vrot.slane %v1949_v20, 5  ;;  %v2386_v0 = vor.u32 %v2385_v1, %v2382_v25 }
 0x196   : > { %3686 = vmatprep.mubr.bf16.mxu0 %v3986_v63  ;;  %3715 = vmatpush3.bf16.msra.mxu0 %v3985_v54  ;;  %v1712_v54 = vshll.u32 %v1651_v44, 16  ;;  %v1742_v63 = vrot.slane %v1740_v52, 5  ;;  %v1754_v7 = vshll.u32 %v1657_v58, 16  ;;  %v1765_v13 = vor.u32 %v1764_v62, %v1761_v32 }
 0x197   : > { %3716 = vmatprep.subr.bf16.mxu0 %v3988_v60  ;;  %3698 = vmatprep.subr.bf16.mxu1 %v3989_v4  ;;  %v3329_v44 = vrot.slane %v1948_v19, 9  ;;  %v2387_v19 = vrot.slane %v2386_v0, 4  ;;  %v4019_v0 = vld [vmem:[#allocation9 + $0x230] sm:$0xff]  }
 0x198   : > { %v1743_v17 = vsel %vm4563_vm11, %v1738_v51, %v1742_v63  ;;  %v1766_v37 = vrot.slane %v1765_v13, 4  ;;  %v1956_v51 = vld [vmem:[#allocation2 + $0x40] sm:$0xe]  ;;  %v1957_v63 = vld [vmem:[#allocation2 + $0x44] sm:$0x1] }
 0x199   : > { %3699 = vmatpush3.bf16.msra.mxu1 %v3989_v4  ;;  %v1714_v4 = vrot.slane %v1712_v54, 5  ;;  %v1984_v54 = vrot.slane %v1947_v45, 5  ;;  %v1989_v58 = vsel %vm4578_vm12, %v3329_v44, %v1988_v46  ;;  %v4012_v45 = vld [vmem:[#allocation9 + $0x1d8] sm:$0xff]  }
 0x19a   : > { %3717 = vmatpush3.bf16.msra.mxu0 %v3988_v60  ;;  %3700 = vmatprep.subr.bf16.mxu1 %v3992_v22  ;;  %v1747_v60 = vrot.slane %v1745_v47, 4  ;;  %v1771_v52 = vsel %vm4563_vm11, %v1766_v37, %v1770_v38  ;;  %v2369_v37 = vld [vmem:[#allocation2 + $0x28] sm:$0xf] }
 0x19b   : > { %3718 = vmatprep.subr.bf16.mxu0 %v3991_v16  ;;  %v1715_v10 = vsel %vm4563_vm11, %v1710_v57, %v1714_v4  ;;  %v2399_v57 = vrot.slane %v2397_v43, 5  ;;  %v4003_v4 = vld [vmem:[#allocation2 + $0x10] ss:$8 sps:$4 sm:$0xff]   ;;  %v4653_v38 = vld [vmem:[#allocation2 + $0x48] sm:$0xf]  ;;  %v2422_v43 = vshrl.u32 %v2369_v37, 16 }
 0x19c   : > { %v1751_v11 = vor.u32 %v1750_v61, %v1747_v60  ;;  %v1954_v60 = vld [vmem:[#allocation2 + $0x38] sm:$0xe]  ;;  %v2364_v61 = vld [vmem:[#allocation2 + $0x14] sm:$0x1]  ;;  %v2425_v44 = vshll.u32 %v2369_v37, 16  ;;  %v2478_v46 = vshrl.u32 %v4653_v38, 16 }
 0x19d   : > { %3687 = vmatmul.mubr.bf16.gmra.mxu0 %v3990_v21  ;;  %3701 = vmatpush3.bf16.msra.mxu1 %v3992_v22  ;;  %v1701_v21 = vsel %vm4563_vm11, %v1696_v2, %v1700_v8  ;;  %v1756_v22 = vrot.slane %v1754_v7, 5  ;;  %v2366_v7 = vld [vmem:[#allocation2 + $0x1c] sm:$0x1] }
 0x19e   : > { %3719 = vmatpush3.bf16.msra.mxu0 %v3991_v16  ;;  %3730 = vmatprep.mubr.bf16.mxu0 %v3334_v42  ;;  %v1729_v16 = vsel %vm4563_vm11, %v1724_v27, %v1728_v50  ;;  %v3315_v26 = vcombine.low %v1701_v21, %v1715_v10  ;;  %v1752_v36 = vrot.slane %v1751_v11, 4  ;;  %v1946_v42 = vld [vmem:[#allocation2 + $0x18] sm:$0xe]  ;;  %v1955_v50 = vld [vmem:[#allocation2 + $0x3c] sm:$0x1]  ;;  %v3332_v10 = vrot.slane %v1954_v60, 9 }
 0x19f   : > { %3720 = vmatprep.subr.bf16.mxu0 %v3993_v23  ;;  %3702 = vmatprep.subr.bf16.mxu1 %v3994_v41  ;;  %v3316_v34 = vcombine.low %v1729_v16, %v1743_v17  ;;  %v3328_v53 = vrot.slane %v1946_v42, 9  ;;  %v2389_v11 = vshll.u32 %v2364_v61, 16  ;;  %v2000_v15 = vrot.slane %v1955_v50, 5  ;;  %v4008_v21 = vld [vmem:[#allocation9 + $0x1e8] sm:$0xff]  }
 0x1a0   : > { %v1757_v33 = vsel %vm4563_vm11, %v1752_v36, %v1756_v22  ;;  %v3333_v16 = vrot.slane %v1956_v51, 9  ;;  %v2004_v17 = vrot.slane %v1957_v63, 5  ;;  %v2403_v20 = vshll.u32 %v2366_v7, 16  ;;  %v4011_v36 = vld [vmem:[#allocation9 + $0x188] sm:$0xff]   ;;  %v2372_v51 = vld [vmem:[#allocation2 + $0x34] sm:$0x1] }
 0x1a1   : > { %3703 = vmatpush3.bf16.msra.mxu1 %v3994_v41  ;;  %v2394_v41 = vshrl.u32 %v2365_v24, 16  ;;  %v3317_v32 = vcombine.low %v1757_v33, %v1771_v52  ;;  %v1985_v2 = vsel %vm4578_vm12, %v3328_v53, %v1984_v54  ;;  %v2373_v42 = vld [vmem:[#allocation2 + $0x38] sm:$0xf]  ;;  %v4014_v33 = vld [vmem:[#allocation9 + $0x1d0] sm:$0xff]   ;;  %v2481_v52 = vshll.u32 %v4653_v38, 16  ;;  %v4016_v53 = vld [vmem:[#allocation9 + $0x238] sm:$0xff]  }
 0x1a2   : > { %3721 = vmatpush3.bf16.msra.mxu0 %v3993_v23  ;;  %3704 = vmatprep.subr.bf16.mxu1 %v3996_v55  ;;  %v1950_v23 = vld [vmem:[#allocation2 + $0x28] sm:$0xe]  ;;  %v3335_v8 = vcombine.low %v1985_v2, %v1989_v58  ;;  %v2005_v24 = vsel %vm4578_vm12, %v3333_v16, %v2004_v17  ;;  %v2405_v29 = vrot.slane %v2403_v20, 5  ;;  %v2370_v54 = vld [vmem:[#allocation2 + $0x2c] sm:$0x1]  ;;  %v4018_v58 = vld [vmem:[#allocation9 + $0x1c8] sm:$0xff]  }
 0x1a3   : > { %3722 = vmatprep.subr.bf16.mxu0 %v3995_v49  ;;  %v3330_v47 = vrot.slane %v1950_v23, 9  ;;  %v2396_v56 = vrot.slane %v2394_v41, 4  ;;  %v2001_v23 = vsel %vm4578_vm12, %v3332_v10, %v2000_v15  ;;  %v2367_v41 = vld [vmem:[#allocation2 + $0x20] sm:$0xf]  ;;  %v2374_v63 = vld [vmem:[#allocation2 + $0x3c] sm:$0x1] }
 0x1a4   : > { %v3337_v31 = vcombine.low %v2001_v23, %v2005_v24  ;;  %v2408_v25 = vshrl.u32 %v2367_v41, 16  ;;  %v2411_v1 = vshll.u32 %v2367_v41, 16  ;;  %v2368_v2 = vld [vmem:[#allocation2 + $0x24] sm:$0x1]  ;;  %v2661_v7 = vld [vmem:[#allocation2 + $0x10] sm:$0xe] }
 0x1a5   : > { %3705 = vmatpush3.bf16.msra.mxu1 %v3996_v55  ;;  %v4004_v55 = vld [vmem:[#allocation9 + $0x1f8] sm:$0xff]   ;;  %v1993_v62 = vsel %vm4578_vm12, %v3330_v47, %v1992_v5  ;;  %v2400_v13 = vor.u32 %v2399_v57, %v2396_v56  ;;  %v4013_v47 = vld [vmem:[#allocation9 + $0x180] sm:$0xff]   ;;  %v2427_v56 = vrot.slane %v2425_v44, 5  ;;  %v4657_v57 = vrot.slane %v2478_v46, 4  ;;  %v2663_v10 = vld [vmem:[#allocation2 + $0x18] sm:$0xe] }
 0x1a6   : > { %3723 = vmatpush3.bf16.msra.mxu0 %v3995_v49  ;;  %3738 = vmatprep.subr.bf16.mxu1 %v3998_v9  ;;  %v1996_v49 = vrot.slane %v1953_v40, 5  ;;  %v2371_v40 = vld [vmem:[#allocation2 + $0x30] sm:$0xf]  ;;  %v2413_v50 = vrot.slane %v2411_v1, 5  ;;  %v2664_v15 = vld [vmem:[#allocation2 + $0x1c] sm:$0x1] }
 0x1a7   : > { %3724 = vmatprep.subr.bf16.mxu0 %v3997_v59  ;;  %v2401_v22 = vrot.slane %v2400_v13, 4  ;;  %v2436_v5 = vshrl.u32 %v2371_v40, 16  ;;  %v2445_v17 = vshll.u32 %v2372_v51, 16  ;;  %v4017_v20 = vld [vmem:[#allocation2 + $0x30] ss:$8 sps:$4 sm:$0xff]   ;;  %v2483_v23 = vrot.slane %v2481_v52, 5 }
 0x1a8   : > { %3707 = vmatmul.mubr.bf16.vlgmr.msra.gmra.mxu1 %v3315_v26  ;;  %v1997_v27 = vsel %vm4578_vm12, %v3331_v48, %v1996_v49  ;;  %v2450_v48 = vshrl.u32 %v2373_v42, 16  ;;  %v2453_v49 = vshll.u32 %v2373_v42, 16  ;;  %v4020_v24 = vld [vmem:[#allocation9 + $0x1c0] sm:$0xff]   ;;  %v2376_v41 = vld [vmem:[#allocation2 + $0x44] sm:$0x1] }
 0x1a9   : > { %3710 = vmatprep.mubr.bf16.mxu1 %v3316_v34  ;;  %3739 = vmatpush3.bf16.msra.mxu1 %v3998_v9  ;;  %v4006_v9 = vld [vmem:[#allocation9 + $0x1f0] sm:$0xff]   ;;  %v3336_v14 = vcombine.low %v1993_v62, %v1997_v27  ;;  %v2406_v12 = vsel %vm4563_vm11, %v2401_v22, %v2405_v29  ;;  %v4010_v34 = vld [vmem:[#allocation9 + $0x1e0] sm:$0xff]   ;;  %v2410_v27 = vrot.slane %v2408_v25, 4  ;;  %v2378_v22 = vld [vmem:[#allocation2 + $0x4c] sm:$0x1]  ;;  %v3370_v29 = vrot.slane %v2661_v7, 9 }
 0x1aa   : > { %3725 = vmatpush3.bf16.msra.mxu0 %v3997_v59  ;;  %3740 = vmatprep.subr.bf16.mxu1 %v4000_v6  ;;  %v4005_v59 = vld [vmem:[#allocation9 + $0x1a0] sm:$0xff]   ;;  %v2452_v61 = vrot.slane %v2450_v48, 4  ;;  %v2375_v62 = vld [vmem:[#allocation2 + $0x40] sm:$0xf]  ;;  %v2484_v46 = vor.u32 %v2483_v23, %v4657_v57 }
 0x1ab   : > { %3726 = vmatprep.subr.bf16.mxu0 %v3999_v18  ;;  %v2467_v13 = vshll.u32 %v2375_v62, 16  ;;  %v4021_v25 = vld [vmem:[#allocation2 + $0x40] ss:$8 sps:$4 sm:$0xff]   ;;  %v2670_v7 = vld [vmem:[#allocation2 + $0x34] sm:$0x1] }
 0x1ac   : > { %v2485_v57 = vrot.slane %v2484_v46, 4 }
 0x1ad   : > { %3741 = vmatpush3.bf16.msra.mxu1 %v4000_v6  ;;  %v2391_v6 = vrot.slane %v2389_v11, 5  ;;  %v2464_v11 = vshrl.u32 %v2375_v62, 16  ;;  %v2469_v37 = vrot.slane %v2467_v13, 5  ;;  %v2666_v13 = vld [vmem:[#allocation2 + $0x24] sm:$0x1] }
 0x1ae   : > { %3727 = vmatpush3.bf16.msra.mxu0 %v3999_v18  ;;  %3742 = vmatprep.subr.bf16.mxu1 %v4002_v39  ;;  %v4007_v18 = vld [vmem:[#allocation9 + $0x198] sm:$0xff]  }
 0x1af   : > { %3728 = vmatprep.subr.bf16.mxu0 %v4001_v35  ;;  %v2392_v26 = vsel %vm4563_vm11, %v2387_v19, %v2391_v6  ;;  %v2459_v19 = vshll.u32 %v2374_v63, 16  ;;  %v2417_v6 = vshll.u32 %v2368_v2, 16  ;;  %v4026_v63 = vld [vmem:[#allocation9 + $0x208] sm:$0xff]   ;;  %v2668_v2 = vld [vmem:[#allocation2 + $0x2c] sm:$0x1] }
 0x1b0   : > { %3711 = vmatmul.mubr.bf16.gmra.mxu1 %v3317_v32  ;;  %v2455_v32 = vrot.slane %v2453_v49, 5  ;;  %v2473_v49 = vshll.u32 %v2376_v41, 16  ;;  %v4029_v41 = vld [vmem:[#allocation10 + $0x30] sm:$0xff]  }
 0x1b1   : > { %3743 = vmatpush3.bf16.msra.mxu1 %v4002_v39  ;;  %3754 = vmatprep.mubr.bf16.mxu1 %v4003_v4  ;;  %v2439_v39 = vshll.u32 %v2371_v40, 16  ;;  %v2431_v4 = vshll.u32 %v2370_v54, 16  ;;  %v2447_v40 = vrot.slane %v2445_v17, 5 }
 0x1b2   : > { %3729 = vmatpush3.bf16.msra.mxu0 %v4001_v35  ;;  %3744 = vmatprep.subr.bf16.mxu1 %v4005_v59  ;;  %v3358_v35 = vcombine.low %v2392_v26, %v2406_v12  ;;  %v4022_v12 = vld [vmem:[#allocation9 + $0x228] sm:$0xff]  }
 0x1b3   : > { %3762 = vmatprep.subr.bf16.mxu0 %v4004_v55  ;;  %v2441_v60 = vrot.slane %v2439_v39, 5  ;;  %v2433_v26 = vrot.slane %v2431_v4, 5  ;;  %v2669_v4 = vld [vmem:[#allocation2 + $0x30] sm:$0xe] }
 0x1b5   : > { %3731 = vmatmul.mubr.bf16.vlgmr.msra.gmra.mxu0 %v3335_v8  ;;  %3745 = vmatpush3.bf16.msra.mxu1 %v4005_v59  ;;  %v2438_v59 = vrot.slane %v2436_v5, 4  ;;  %v2419_v5 = vrot.slane %v2417_v6, 5  ;;  %v2675_v6 = vld [vmem:[#allocation2 + $0x48] sm:$0xe] }
 0x1b6   : > { %3734 = vmatprep.mubr.bf16.mxu0 %v3336_v14  ;;  %3763 = vmatpush3.bf16.msra.mxu0 %v4004_v55  ;;  %v2424_v55 = vrot.slane %v2422_v43, 4  ;;  %v4015_v14 = vld [vmem:[#allocation2 + $0x20] ss:$8 sps:$4 sm:$0xff]  }
 0x1b7   : > { %3764 = vmatprep.subr.bf16.mxu0 %v4006_v9  ;;  %3746 = vmatprep.subr.bf16.mxu1 %v4007_v18  ;;  %v2442_v16 = vor.u32 %v2441_v60, %v2438_v59  ;;  %v2475_v60 = vrot.slane %v2473_v49, 5  ;;  %v4035_v49 = vld [vmem:[#allocation10] sm:$0xff]  }
 0x1b8   : > { %v2428_v8 = vor.u32 %v2427_v56, %v2424_v55 }
 0x1b9   : > { %3747 = vmatpush3.bf16.msra.mxu1 %v4007_v18  ;;  %v2456_v18 = vor.u32 %v2455_v32, %v2452_v61  ;;  %v2443_v38 = vrot.slane %v2442_v16, 4  ;;  %v4024_v32 = vld [vmem:[#allocation9 + $0x218] sm:$0xff]   ;;  %v2711_v16 = vrot.slane %v2670_v7, 5 }
 0x1ba   : > { %3765 = vmatpush3.bf16.msra.mxu0 %v4006_v9  ;;  %3748 = vmatprep.subr.bf16.mxu1 %v4009_v30  ;;  %v2662_v9 = vld [vmem:[#allocation2 + $0x14] sm:$0x1] }
 0x1bb   : > { %3766 = vmatprep.subr.bf16.mxu0 %v4008_v21  ;;  %v2457_v42 = vrot.slane %v2456_v18, 4 }
 0x1bd   : > { %3735 = vmatmul.mubr.bf16.gmra.mxu0 %v3337_v31  ;;  %3749 = vmatpush3.bf16.msra.mxu1 %v4009_v30  ;;  %v2695_v30 = vrot.slane %v2662_v9, 5  ;;  %v3371_v31 = vrot.slane %v2663_v10, 9  ;;  %v2672_v9 = vld [vmem:[#allocation2 + $0x3c] sm:$0x1]  ;;  %v4027_v10 = vld [vmem:[#allocation9 + $0x200] sm:$0xff]  }
 0x1be   : > { %3767 = vmatpush3.bf16.msra.mxu0 %v4008_v21  ;;  %3778 = vmatprep.mubr.bf16.mxu0 %v3358_v35  ;;  %v2414_v21 = vor.u32 %v2413_v50, %v2410_v27  ;;  %v2699_v35 = vrot.slane %v2664_v15, 5  ;;  %v4025_v50 = vld [vmem:[#allocation9 + $0x210] sm:$0xff]   ;;  %v3374_v15 = vrot.slane %v2669_v4, 9  ;;  %v2715_v18 = vrot.slane %v2672_v9, 5 }
 0x1bf   : > { %3768 = vmatprep.subr.bf16.mxu0 %v4010_v34  ;;  %3750 = vmatprep.subr.bf16.mxu1 %v4011_v36  ;;  %v2696_v44 = vsel %vm4578_vm12, %v3370_v29, %v2695_v30  ;;  %v2676_v29 = vld [vmem:[#allocation2 + $0x4c] sm:$0x1] }
 0x1c0   : > { %v2415_v43 = vrot.slane %v2414_v21, 4  ;;  %v2700_v1 = vsel %vm4578_vm12, %v3371_v31, %v2699_v35 }
 0x1c1   : > { %3751 = vmatpush3.bf16.msra.mxu1 %v4011_v36  ;;  %v2466_v36 = vrot.slane %v2464_v11, 4  ;;  %v3378_v55 = vcombine.low %v2696_v44, %v2700_v1  ;;  %v2665_v11 = vld [vmem:[#allocation2 + $0x20] sm:$0xe]  ;;  %v4031_v44 = vld [vmem:[#allocation10 + $0x20] sm:$0xff]  }
 0x1c2   : > { %3769 = vmatpush3.bf16.msra.mxu0 %v4010_v34  ;;  %3752 = vmatprep.subr.bf16.mxu1 %v4013_v47  ;;  %v2429_v34 = vrot.slane %v2428_v8, 4  ;;  %v2420_v54 = vsel %vm4563_vm11, %v2415_v43, %v2419_v5  ;;  %v2671_v8 = vld [vmem:[#allocation2 + $0x38] sm:$0xe] }
 0x1c3   : > { %3770 = vmatprep.subr.bf16.mxu0 %v4012_v45  ;;  %v2470_v48 = vor.u32 %v2469_v37, %v2466_v36  ;;  %v3375_v17 = vrot.slane %v2671_v8, 9  ;;  %v2723_v37 = vrot.slane %v2676_v29, 5  ;;  %v4030_v43 = vld [vmem:[#allocation10 + $0x28] sm:$0xff]  }
 0x1c4   : > { %v2434_v39 = vsel %vm4563_vm11, %v2429_v34, %v2433_v26  ;;  %v2674_v26 = vld [vmem:[#allocation2 + $0x44] sm:$0x1]  ;;  %v4034_v5 = vld [vmem:[#allocation10 + $0x8] sm:$0xff]  }
 0x1c5   : > { %3753 = vmatpush3.bf16.msra.mxu1 %v4013_v47  ;;  %v2487_v47 = vshll.u32 %v2378_v22, 16  ;;  %v3359_v56 = vcombine.low %v2420_v54, %v2434_v39  ;;  %v2471_v59 = vrot.slane %v2470_v48, 4  ;;  %v2712_v22 = vsel %vm4578_vm12, %v3374_v15, %v2711_v16 }
 0x1c6   : > { %3771 = vmatpush3.bf16.msra.mxu0 %v4012_v45  ;;  %3786 = vmatprep.subr.bf16.mxu1 %v4016_v53  ;;  %v2461_v45 = vrot.slane %v2459_v19, 5  ;;  %v3372_v19 = vrot.slane %v2665_v11, 9  ;;  %v2716_v23 = vsel %vm4578_vm12, %v3375_v17, %v2715_v18  ;;  %v2719_v36 = vrot.slane %v2674_v26, 5 }
 0x1c7   : > { %3772 = vmatprep.subr.bf16.mxu0 %v4014_v33  ;;  %v2489_v61 = vrot.slane %v2487_v47, 5  ;;  %v2476_v62 = vsel %vm4563_vm11, %v2471_v59, %v2475_v60  ;;  %v3380_v34 = vcombine.low %v2712_v22, %v2716_v23  ;;  %v4033_v47 = vld [vmem:[#allocation10 + $0x10] sm:$0xff]  }
 0x1c8   : > { %3755 = vmatmul.mubr.bf16.vlgmr.msra.gmra.mxu1 %v4015_v14  ;;  %v2462_v52 = vsel %vm4563_vm11, %v2457_v42, %v2461_v45  ;;  %v2707_v14 = vrot.slane %v2668_v2, 5  ;;  %v4028_v45 = vld [vmem:[#allocation10 + $0x38] sm:$0xff]  }
 0x1c9   : > { %3758 = vmatprep.mubr.bf16.mxu1 %v4017_v20  ;;  %3787 = vmatpush3.bf16.msra.mxu1 %v4016_v53  ;;  %v4023_v53 = vld [vmem:[#allocation9 + $0x220] sm:$0xff]   ;;  %v2490_v27 = vsel %vm4563_vm11, %v2485_v57, %v2489_v61  ;;  %v2703_v20 = vrot.slane %v2666_v13, 5 }
 0x1ca   : > { %3773 = vmatpush3.bf16.msra.mxu0 %v4014_v33  ;;  %3788 = vmatprep.subr.bf16.mxu1 %v4019_v0  ;;  %v2448_v33 = vsel %vm4563_vm11, %v2443_v38, %v2447_v40  ;;  %v3361_v51 = vcombine.low %v2476_v62, %v2490_v27 }
 0x1cb   : > { %3774 = vmatprep.subr.bf16.mxu0 %v4018_v58  ;;  %v2704_v30 = vsel %vm4578_vm12, %v3372_v19, %v2703_v20 }
 0x1cd   : > { %3789 = vmatpush3.bf16.msra.mxu1 %v4019_v0  ;;  %v2667_v0 = vld [vmem:[#allocation2 + $0x28] sm:$0xe] }
 0x1ce   : > { %3775 = vmatpush3.bf16.msra.mxu0 %v4018_v58  ;;  %3790 = vmatprep.subr.bf16.mxu1 %v4022_v12  ;;  %v3360_v58 = vcombine.low %v2448_v33, %v2462_v52  ;;  %v3373_v28 = vrot.slane %v2667_v0, 9 }
 0x1cf   : > { %3776 = vmatprep.subr.bf16.mxu0 %v4020_v24 }
 0x1d0   : > { %3759 = vmatmul.mubr.bf16.gmra.mxu1 %v4021_v25  ;;  %v2708_v21 = vsel %vm4578_vm12, %v3373_v28, %v2707_v14 }
 0x1d1   : > { %3791 = vmatpush3.bf16.msra.mxu1 %v4022_v12  ;;  %3802 = vmatprep.mubr.bf16.mxu1 %v3378_v55  ;;  %v3379_v31 = vcombine.low %v2704_v30, %v2708_v21  ;;  %v3377_v12 = vrot.slane %v2675_v6, 9 }
 0x1d2   : > { %3777 = vmatpush3.bf16.msra.mxu0 %v4020_v24  ;;  %3792 = vmatprep.subr.bf16.mxu1 %v4023_v53  ;;  %v2673_v24 = vld [vmem:[#allocation2 + $0x40] sm:$0xe] }
 0x1d3   : > { %v3376_v35 = vrot.slane %v2673_v24, 9  ;;  %v2724_v40 = vsel %vm4578_vm12, %v3377_v12, %v2723_v37  ;;  %3810 = vmatprep.subr.bf16.mxu0 %v4028_v45 }
 0x1d5   : > { %3779 = vmatmul.mubr.bf16.vlgmr.msra.gmra.mxu0 %v3359_v56  ;;  %3793 = vmatpush3.bf16.msra.mxu1 %v4023_v53  ;;  %v2720_v38 = vsel %vm4578_vm12, %v3376_v35, %v2719_v36 }
 0x1d6   : > { %3782 = vmatprep.mubr.bf16.mxu0 %v3360_v58  ;;  %3794 = vmatprep.subr.bf16.mxu1 %v4024_v32  ;;  %v3381_v42 = vcombine.low %v2720_v38, %v2724_v40 }
 0x1d7   : > { %3811 = vmatpush3.bf16.msra.mxu0 %v4028_v45 }
 0x1d8   : > { %3812 = vmatprep.subr.bf16.mxu0 %v4029_v41 }
 0x1d9   : > { %3795 = vmatpush3.bf16.msra.mxu1 %v4024_v32 }
 0x1da   : > { %3796 = vmatprep.subr.bf16.mxu1 %v4025_v50 }
 0x1db   : > { %3813 = vmatpush3.bf16.msra.mxu0 %v4029_v41 }
 0x1dc   : > { %3814 = vmatprep.subr.bf16.mxu0 %v4030_v43 }
 0x1dd   : > { %3783 = vmatmul.mubr.bf16.gmra.mxu0 %v3361_v51  ;;  %3797 = vmatpush3.bf16.msra.mxu1 %v4025_v50 }
 0x1de   : > { %3798 = vmatprep.subr.bf16.mxu1 %v4026_v63 }
 0x1df   : > { %3815 = vmatpush3.bf16.msra.mxu0 %v4030_v43 }
 0x1e0   : > { %3816 = vmatprep.subr.bf16.mxu0 %v4031_v44 }
 0x1e1   : > { %3799 = vmatpush3.bf16.msra.mxu1 %v4026_v63 }
 0x1e2   : > { %3800 = vmatprep.subr.bf16.mxu1 %v4027_v10 }
 0x1e3   : > { %3817 = vmatpush3.bf16.msra.mxu0 %v4031_v44 }
 0x1e4   : > { %3818 = vmatprep.subr.bf16.mxu0 %v4032_v3 }
 0x1e5   : > { %3801 = vmatpush3.bf16.msra.mxu1 %v4027_v10 }
 0x1e6   : > { %3834 = vmatprep.subr.bf16.mxu1 %v4028_v45 }
 0x1e7   : > { %3819 = vmatpush3.bf16.msra.mxu0 %v4032_v3 }
 0x1e8   : > { %3803 = vmatmul.mubr.bf16.vlgmr.msra.gmra.mxu1 %v3379_v31  ;;  %3820 = vmatprep.subr.bf16.mxu0 %v4033_v47 }
 0x1e9   : > { %3806 = vmatprep.mubr.bf16.mxu1 %v3380_v34  ;;  %3842 = vmatpush3.bf16.msra.mxu1 %v4028_v45 }
 0x1ea   : > { %3835 = vmatprep.subr.bf16.mxu1 %v4029_v41 }
 0x1eb   : > { %3821 = vmatpush3.bf16.msra.mxu0 %v4033_v47 }
 0x1ec   : > { %3822 = vmatprep.subr.bf16.mxu0 %v4034_v5 }
 0x1ed   : > { %3843 = vmatpush3.bf16.msra.mxu1 %v4029_v41 }
 0x1ee   : > { %3836 = vmatprep.subr.bf16.mxu1 %v4030_v43 }
 0x1ef   : > { %3823 = vmatpush3.bf16.msra.mxu0 %v4034_v5 }
 0x1f0   : > { %3807 = vmatmul.mubr.bf16.gmra.mxu1 %v3381_v42  ;;  %3824 = vmatprep.subr.bf16.mxu0 %v4035_v49 }
 0x1f1   : > { %3844 = vmatpush3.bf16.msra.mxu1 %v4030_v43 }
 0x1f2   : > { %3837 = vmatprep.subr.bf16.mxu1 %v4031_v44 }
 0x1f3   : > { %3825 = vmatpush3.bf16.msra.mxu0 %v4035_v49 }
 0x1f5   : > { %3845 = vmatpush3.bf16.msra.mxu1 %v4031_v44 }
 0x1f6   : > { %3838 = vmatprep.subr.bf16.mxu1 %v4032_v3 }
 0x1f9   : > { %3846 = vmatpush3.bf16.msra.mxu1 %v4032_v3 }
 0x1fa   : > { %3839 = vmatprep.subr.bf16.mxu1 %v4033_v47 }
 0x1fd   : > { %3847 = vmatpush3.bf16.msra.mxu1 %v4033_v47 }
 0x1fe   : > { %3840 = vmatprep.subr.bf16.mxu1 %v4034_v5 }
 0x201   : > { %3848 = vmatpush3.bf16.msra.mxu1 %v4034_v5 }
 0x202   : > { %3841 = vmatprep.subr.bf16.mxu1 %v4035_v49 }
 0x205   : > { %3849 = vmatpush3.bf16.msra.mxu1 %v4035_v49 }
 0x228   : > { %v4688_v46 = vpop.f32.mrf.mxu1 }
 0x22a   : > { %v4690_v39 = vpop.f32.mrf.mxu1 }
 0x22c   : > { %v4692_v48 = vpop.f32.mrf.mxu1 }
 0x22e   : > { %v884_v1 = vpop.f32.mrf.mxu1 }
 0x232   : > { %v4694_v33 = vpop.f32.mrf.mxu1 }
 0x234   : > { %v4696_v53 = vpop.f32.mrf.mxu1 }
 0x235   : > { %v3636_v25 = vpop.f32.mrf.mxu0 }
 0x236   : > { %v4698_v55 = vpop.f32.mrf.mxu1  ;;  %v1207_v45 = vadd.f32 %v3636_v25, %v4688_v46 }
 0x237   : > { %v1166_v52 = vpop.f32.mrf.mxu0 }
 0x238   : > { %v4700_v57 = vpop.f32.mrf.mxu1  ;;  %v1205_v42 = vadd.f32 %v1166_v52, %v4690_v39 }
 0x239   : > { %v3637_v54 = vpop.f32.mrf.mxu0 }
 0x23a   : > { %v1208_v44 = vadd.f32 %v3637_v54, %v4692_v48 }
 0x23b   : > { %v1169_v56 = vpop.f32.mrf.mxu0 }
 0x23c   : > { %v1206_v5 = vadd.f32 %v1169_v56, %v884_v1 }
 0x23f   : > { %v4702_v58 = vpop.f32.mrf.mxu0 }
 0x240   : > { %v1211_v48 = vadd.f32 %v4702_v58, %v4694_v33 }
 0x241   : > { %v1182_v60 = vpop.f32.mrf.mxu0 }
 0x242   : > { %v1209_v39 = vadd.f32 %v1182_v60, %v4696_v53 }
 0x243   : > { %v3641_v32 = vpop.f32.mrf.mxu0 }
 0x244   : > { %v1212_v54 = vadd.f32 %v3641_v32, %v4698_v55 }
 0x245   : > { %v4704_v27 = vpop.f32.mrf.mxu0 }
 0x248   : > { %v3660_v59 = vpop.f32.mrf.mxu1 }
 0x249   : > { %v1444_v47 = vadd.f32 %v3660_v59, %v1207_v45 }
 0x24a   : > { %v1403_v61 = vpop.f32.mrf.mxu1 }
 0x24b   : > { %v1442_v3 = vadd.f32 %v1403_v61, %v1205_v42 }
 0x24c   : > { %v3661_v62 = vpop.f32.mrf.mxu1 }
 0x24d   : > { %v1445_v49 = vadd.f32 %v3661_v62, %v1208_v44 }
 0x24e   : > { %v1406_v50 = vpop.f32.mrf.mxu1 }
 0x250   : > { %v4706_v63 = vpop.f32.mrf.mxu1 }
 0x251   : > { %v1448_v53 = vadd.f32 %v4706_v63, %v1211_v48 }
 0x252   : > { %v1419_v2 = vpop.f32.mrf.mxu1 }
 0x253   : > { %v1446_v61 = vadd.f32 %v1419_v2, %v1209_v39 }
 0x254   : > { %v3665_v7 = vpop.f32.mrf.mxu1 }
 0x255   : > { %v3684_v51 = vpop.f32.mrf.mxu0  ;;  %v1449_v60 = vadd.f32 %v3665_v7, %v1212_v54 }
 0x256   : > { %v4708_v9 = vpop.f32.mrf.mxu1 }
 0x257   : > { %v1589_v0 = vpop.f32.mrf.mxu0 }
 0x259   : > { %v3685_v4 = vpop.f32.mrf.mxu0 }
 0x25b   : > { %v1592_v8 = vpop.f32.mrf.mxu0 }
 0x25d   : > { %v4710_v10 = vpop.f32.mrf.mxu0 }
 0x25e   : > { %v1634_v32 = vadd.f32 %v4710_v10, %v1448_v53 }
 0x25f   : > { %v1605_v13 = vpop.f32.mrf.mxu0 }
 0x261   : > { %v4712_v14 = vpop.f32.mrf.mxu0 }
 0x262   : > { %v1635_v2 = vadd.f32 %v4712_v14, %v1449_v60  ;;  %v3390_v14 = vld [vmem:[%s4819_s4] ss:$0 sm:$0xff] }
 0x263   : > { %v4714_v16 = vpop.f32.mrf.mxu0 }
 0x268   : > { %v3708_v11 = vpop.f32.mrf.mxu1 }
 0x26a   : > { %v1887_v28 = vpop.f32.mrf.mxu1 }
 0x26c   : > { %v3709_v15 = vpop.f32.mrf.mxu1 }
 0x26e   : > { %v1890_v17 = vpop.f32.mrf.mxu1 }
 0x270   : > { %v4716_v19 = vpop.f32.mrf.mxu1 }
 0x271   : > { %4855 = vst [vmem:[#allocation17_spill] sm:$0xff] %v4716_v19 }
 0x272   : > { %v1903_v21 = vpop.f32.mrf.mxu1 }
 0x274   : > { %v4718_v22 = vpop.f32.mrf.mxu1 }
 0x275   : > { %v3732_v18 = vpop.f32.mrf.mxu0  ;;  %4856 = vst [vmem:[#allocation18_spill] sm:$0xff] %v4718_v22  ;;  %v1631_v22 = vadd.f32 %v3685_v4, %v1445_v49 }
 0x276   : > { %v4720_v24 = vpop.f32.mrf.mxu1 }
 0x277   : > { %v2121_v20 = vpop.f32.mrf.mxu0  ;;  %4857 = vst [vmem:[#allocation19_spill] sm:$0xff] %v4720_v24  ;;  %v1929_v46 = vadd.f32 %v3709_v15, %v1631_v22 }
 0x279   : > { %v3733_v6 = vpop.f32.mrf.mxu0 }
 0x27b   : > { %v2124_v23 = vpop.f32.mrf.mxu0 }
 0x27d   : > { %v4722_v26 = vpop.f32.mrf.mxu0 }
 0x27e   : > { %4858 = vst [vmem:[#allocation20_spill] sm:$0xff] %v4722_v26  ;;  %v1630_v26 = vadd.f32 %v3684_v51, %v1444_v47  ;;  %v2163_v51 = vadd.f32 %v3733_v6, %v1929_v46  ;;  %v4864_v6 = vld [vmem:[#allocation18_spill] sm:$0xff] }
 0x27f   : > { %v4724_v30 = vpop.f32.mrf.mxu0  ;;  %v1933_v22 = vadd.f32 %v4864_v6, %v1635_v2  ;;  %v4041_v6 = vld [vmem:[%s4427_s12] sm:$0xff]  }
 0x280   : > { %4859 = vst [vmem:[#allocation21_spill] sm:$0xff] %v4724_v30  ;;  %v1443_v30 = vadd.f32 %v1406_v50, %v1206_v5  ;;  %v1928_v19 = vadd.f32 %v3708_v11, %v1630_v26  ;;  %v1632_v11 = vadd.f32 %v1605_v13, %v1446_v61 }
 0x281   : > { %v4726_v12 = vpop.f32.mrf.mxu0 }
 0x282   : > { %4860 = vst [vmem:[#allocation22_spill] sm:$0xff] %v4726_v12  ;;  %v1628_v12 = vadd.f32 %v1589_v0, %v1442_v3  ;;  %v1629_v52 = vadd.f32 %v1592_v8, %v1443_v30  ;;  %v2162_v1 = vadd.f32 %v3732_v18, %v1928_v19  ;;  %v1210_v0 = vadd.f32 %v4704_v27, %v4700_v57 }
 0x283   : > { %v4728_v35 = vpop.f32.mrf.mxu0  ;;  %v1930_v19 = vadd.f32 %v1903_v21, %v1632_v11  ;;  %v4866_v21 = vld [vmem:[#allocation19_spill] sm:$0xff] }
 0x284   : > { %4861 = vst [vmem:[#allocation23_spill] sm:$0xff] %v4728_v35  ;;  %v1927_v62 = vadd.f32 %v1890_v17, %v1629_v52  ;;  %v1447_v55 = vadd.f32 %v4708_v9, %v1210_v0 }
 0x286   : > { %v1633_v7 = vadd.f32 %v4714_v16, %v1447_v55 }
 0x287   : > { %v4865_v9 = vld [vmem:[#allocation21_spill] sm:$0xff] }
 0x288   : > { %v3756_v29 = vpop.f32.mrf.mxu1 }
 0x289   : > { %v2349_v4 = vadd.f32 %v3756_v29, %v2162_v1  ;;  %v2164_v29 = vadd.f32 %v4865_v9, %v1930_v19 }
 0x28a   : > { %v2308_v31 = vpop.f32.mrf.mxu1 }
 0x28b   : > { %v4869_v44 = vld [vmem:[#allocation23_spill] sm:$0xff] }
 0x28c   : > { %v3757_v34 = vpop.f32.mrf.mxu1 }
 0x28d   : > { %v2350_v33 = vadd.f32 %v3757_v34, %v2163_v51 }
 0x28e   : > { %v2311_v36 = vpop.f32.mrf.mxu1 }
 0x290   : > { %v4730_v38 = vpop.f32.mrf.mxu1 }
 0x291   : > { %4862 = vst [vmem:[#allocation24_spill] sm:$0xff] %v4730_v38  ;;  %v1926_v38 = vadd.f32 %v1887_v28, %v1628_v12  ;;  %v2161_v28 = vadd.f32 %v2124_v23, %v1927_v62  ;;  %v4867_v12 = vld [vmem:[#allocation20_spill] sm:$0xff] }
 0x292   : > { %v2324_v41 = vpop.f32.mrf.mxu1 }
 0x293   : > { %v2160_v25 = vadd.f32 %v2121_v20, %v1926_v38  ;;  %v2348_v57 = vadd.f32 %v2311_v36, %v2161_v28  ;;  %v4863_v20 = vld [vmem:[#allocation17_spill] sm:$0xff]  ;;  %v4868_v36 = vld [vmem:[#allocation22_spill] sm:$0xff] }
 0x294   : > { %v3761_v35 = vpop.f32.mrf.mxu1  ;;  %v1932_v13 = vadd.f32 %v4863_v20, %v1634_v32  ;;  %v2167_v16 = vadd.f32 %v4868_v36, %v1933_v22  ;;  %v3066_v22 = vunpack.c.l.bf16 %v4041_v6  ;;  %v4042_v36 = vld [vmem:[%s4427_s12 + $0x18] sm:$0xff]  }
 0x295   : > { %v3780_v37 = vpop.f32.mrf.mxu0  ;;  %v2347_v50 = vadd.f32 %v2308_v31, %v2160_v25  ;;  %v1931_v31 = vadd.f32 %v4866_v21, %v1633_v7  ;;  %v4040_v7 = vld [vmem:[%s4427_s12 + $0x8] sm:$0xff]  }
 0x296   : > { %v2327_v56 = vpop.f32.mrf.mxu1  ;;  %v2647_v15 = vadd.f32 %v3780_v37, %v2349_v4  ;;  %v2166_v34 = vadd.f32 %v4867_v12, %v1932_v13  ;;  %v2354_v39 = vadd.f32 %v3761_v35, %v2167_v16  ;;  %v3068_v20 = vunpack.c.l.bf16 %v4040_v7 }
 0x297   : > { %v2606_v40 = vpop.f32.mrf.mxu0  ;;  %v2165_v3 = vadd.f32 %v4869_v44, %v1931_v31  ;;  %v3072_v16 = vunpack.c.l.bf16 %v4042_v36 }
 0x298   : > { %v2645_v58 = vadd.f32 %v2606_v40, %v2347_v50  ;;  %v2351_v40 = vadd.f32 %v2324_v41, %v2164_v29  ;;  %v3067_v29 = vunpack.c.h.bf16 %v4041_v6 }
 0x299   : > { %v3781_v43 = vpop.f32.mrf.mxu0  ;;  %v2352_v25 = vadd.f32 %v2327_v56, %v2165_v3  ;;  %v3073_v3 = vunpack.c.h.bf16 %v4042_v36 }
 0x29a   : > { %v2648_v27 = vadd.f32 %v3781_v43, %v2350_v33 }
 0x29b   : > { %v2609_v24 = vpop.f32.mrf.mxu0 }
 0x29c   : > { %v2646_v10 = vadd.f32 %v2609_v24, %v2348_v57  ;;  %v4870_v24 = vld [vmem:[#allocation24_spill] sm:$0xff]  ;;  %v3391_v57 = vld [vmem:[%s4821_s6] ss:$0 sm:$0xff] }
 0x29d   : > { %v3784_v59 = vpop.f32.mrf.mxu0  ;;  %v2353_v47 = vadd.f32 %v4870_v24, %v2166_v34 }
 0x29f   : > { %v2622_v17 = vpop.f32.mrf.mxu0  ;;  %v2651_v48 = vadd.f32 %v3784_v59, %v2353_v47 }
 0x2a0   : > { %v2649_v52 = vadd.f32 %v2622_v17, %v2351_v40 }
 0x2a1   : > { %v3785_v37 = vpop.f32.mrf.mxu0 }
 0x2a2   : > { %v2652_v62 = vadd.f32 %v3785_v37, %v2354_v39 }
 0x2a3   : > { %v2625_v54 = vpop.f32.mrf.mxu0 }
 0x2a4   : > { %v2650_v4 = vadd.f32 %v2625_v54, %v2352_v25 }
 0x2a8   : > { %v3804_v8 = vpop.f32.mrf.mxu1 }
 0x2a9   : > { %v2881_v23 = vadd.f32 %v3804_v8, %v2647_v15 }
 0x2aa   : > { %v2840_v18 = vpop.f32.mrf.mxu1 }
 0x2ab   : > { %v2879_v63 = vadd.f32 %v2840_v18, %v2645_v58  ;;  %v2912_v5 = vadd.f32 %v3390_v14, %v2881_v23 }
 0x2ac   : > { %v3805_v26 = vpop.f32.mrf.mxu1 }
 0x2ad   : > { %v2882_v30 = vadd.f32 %v3805_v26, %v2648_v27  ;;  %v2910_v42 = vadd.f32 %v3390_v14, %v2879_v63  ;;  %v2920_v0 = vmax.f32 %v2912_v5, 0.0  ;;  %v3069_v26 = vunpack.c.h.bf16 %v4040_v7 }
 0x2ae   : > { %v2843_v38 = vpop.f32.mrf.mxu1 }
 0x2af   : > { %v2913_v45 = vadd.f32 %v3390_v14, %v2882_v30  ;;  %v2880_v43 = vadd.f32 %v2843_v38, %v2646_v10  ;;  %v2918_v51 = vmax.f32 %v2910_v42, 0.0 }
 0x2b0   : > { %v3808_v49 = vpop.f32.mrf.mxu1 }
 0x2b1   : > { %v2911_v46 = vadd.f32 %v3390_v14, %v2880_v43  ;;  %v2921_v1 = vmax.f32 %v2913_v45, 0.0  ;;  %v2885_v53 = vadd.f32 %v3808_v49, %v2651_v48  ;;  %v4043_v43 = vld [vmem:[%s4427_s12 + $0x10] sm:$0xff]   ;;  %s4150_s12 = scalar_lea.vmem %s4767_s21, 512 }
 0x2b2   : > { %v2856_v61 = vpop.f32.mrf.mxu1  ;;  %v3070_v44 = vunpack.c.l.bf16 %v4043_v43  ;;  %v3071_v48 = vunpack.c.h.bf16 %v4043_v43  ;;  %p4151_p7 = scmp.ne.s32.totalorder %s4767_s21, %s4150_s12  ;;  %p4158_p0 = scmp.lt.s32.totalorder %s4156_s9, %s4150_s12 }
 0x2b3   : > { %v2919_v41 = vmax.f32 %v2911_v46, 0.0  ;;  %v2883_v50 = vadd.f32 %v2856_v61, %v2649_v52  ;;  %v2927_v28 = vpack.c.bf16 %v2921_v1, %v2920_v0  ;;  %v2916_v56 = vadd.f32 %v3390_v14, %v2885_v53 }
 0x2b4   : > { %v3809_v60 = vpop.f32.mrf.mxu1  ;;  %p4152_p12 = pnand %p4151_p7, %p4871_p1  ;;  %p4159_p2 = por %p4158_p0, %p4157_p13 }
 0x2b5   : > { %v2886_v8 = vadd.f32 %v3809_v60, %v2652_v62  ;;  %v2926_v11 = vpack.c.bf16 %v2919_v41, %v2918_v51  ;;  %v2914_v35 = vadd.f32 %v3390_v14, %v2883_v50  ;;  %v2924_v17 = vmax.f32 %v2916_v56, 0.0 }
 0x2b6   : > { %v2859_v33 = vpop.f32.mrf.mxu1  ;;  %p4153_p9 = pneg %p4152_p12 }
 0x2b7   : > { %v2917_v58 = vadd.f32 %v3390_v14, %v2886_v8  ;;  %v2884_v55 = vadd.f32 %v2859_v33, %v2650_v4  ;;  %3826 = vmatprep.mubr.bf16.mxu0 %v2926_v11  ;;  %v2922_v2 = vmax.f32 %v2914_v35, 0.0 }
 0x2b8   : > { %3827 = vmatmul.mubr.bf16.vlgmr.msra.gmra.mxu0 %v2927_v28  ;;  %p4160_p10 = pnand %p4159_p2, %p4153_p9 }
 0x2b9   : > { %v2915_v59 = vadd.f32 %v3390_v14, %v2884_v55  ;;  %v2925_v32 = vmax.f32 %v2917_v58, 0.0 }
 0x2bb   : > { %v2923_v15 = vmax.f32 %v2915_v59, 0.0  ;;  %v2929_v19 = vpack.c.bf16 %v2925_v32, %v2924_v17 }
 0x2bd   : > { %v2928_v18 = vpack.c.bf16 %v2923_v15, %v2922_v2 }
 0x2bf   : > { %3830 = vmatprep.mubr.bf16.mxu1 %v2928_v18 }
 0x2c0   : > { %3831 = vmatmul.mubr.bf16.vlgmr.msra.gmra.mxu1 %v2929_v19 }
 0x378   : > { %v3828_v27 = vpop.f32.mrf.mxu0 }
 0x379   : > { %v3044_v63 = vadd.f32 %v3828_v27, %v3391_v57 }
 0x37a   : > { %v3035_v13 = vpop.f32.mrf.mxu0 }
 0x37b   : > { %v3036_v23 = vadd.f32 %v3391_v57, %v3035_v13  ;;  %v3076_v10 = vadd.f32 %v3068_v20, %v3044_v63 }
 0x37c   : > { %v3829_v9 = vpop.f32.mrf.mxu0 }
 0x37d   : > { %v3047_v14 = vadd.f32 %v3829_v9, %v3391_v57  ;;  %v3074_v21 = vadd.f32 %v3066_v22, %v3036_v23  ;;  %v3084_v37 = vmax.f32 %v3076_v10, 0.0 }
 0x37e   : > { %v3038_v30 = vpop.f32.mrf.mxu0 }
 0x37f   : > { %v3077_v31 = vadd.f32 %v3069_v26, %v3047_v14  ;;  %v3039_v12 = vadd.f32 %v3391_v57, %v3038_v30  ;;  %v3082_v24 = vmax.f32 %v3074_v21, 0.0 }
 0x380   : > { %v3832_v34 = vpop.f32.mrf.mxu1 }
 0x381   : > { %v3085_v38 = vmax.f32 %v3077_v31, 0.0  ;;  %v3075_v40 = vadd.f32 %v3067_v29, %v3039_v12  ;;  %v3060_v42 = vadd.f32 %v3832_v34, %v3391_v57 }
 0x382   : > { %v3051_v45 = vpop.f32.mrf.mxu1 }
 0x383   : > { %v3423_v47 = vpack.c.bf16 %v3085_v38, %v3084_v37  ;;  %v3083_v5 = vmax.f32 %v3075_v40, 0.0  ;;  %v3052_v49 = vadd.f32 %v3391_v57, %v3051_v45  ;;  %v3080_v46 = vadd.f32 %v3072_v16, %v3060_v42 }
 0x384   : > { %v3833_v39 = vpop.f32.mrf.mxu1 }
 0x385   : > { %3435 = vst [vmem:[%s340_s11 + $0x8] sm:$0xff] %v3423_v47   ;;  %v3418_v52 = vpack.c.bf16 %v3083_v5, %v3082_v24  ;;  %v3063_v25 = vadd.f32 %v3833_v39, %v3391_v57  ;;  %v3078_v1 = vadd.f32 %v3070_v44, %v3052_v49  ;;  %v3088_v51 = vmax.f32 %v3080_v46, 0.0 }
 0x386   : > { %v3054_v54 = vpop.f32.mrf.mxu1 }
 0x387   : > { %3419 = vst [vmem:[%s340_s11] sm:$0xff] %v3418_v52   ;;  %v3081_v61 = vadd.f32 %v3073_v3, %v3063_v25  ;;  %v3055_v62 = vadd.f32 %v3391_v57, %v3054_v54  ;;  %v3086_v0 = vmax.f32 %v3078_v1, 0.0 }
 0x389   : > { %v3089_v41 = vmax.f32 %v3081_v61, 0.0  ;;  %v3079_v50 = vadd.f32 %v3071_v48, %v3055_v62 }
 0x38b   : > { %v3433_v53 = vpack.c.bf16 %v3089_v41, %v3088_v51  ;;  %v3087_v60 = vmax.f32 %v3079_v50, 0.0 }
 0x38d   : > { %3437 = vst [vmem:[%s340_s11 + $0x18] sm:$0xff] %v3433_v53   ;;  %v3428_v4 = vpack.c.bf16 %v3087_v60, %v3086_v0 }
 0x38f   : > { %3436 = vst [vmem:[%s340_s11 + $0x10] sm:$0xff] %v3428_v4  }
 0x390   : > { %4163 = shalt.err (!%p4160_p10)
}
 0x391   : > { %s4164_s10 = scalar_lea.hbm %s4772_s1, 512  ;;  %s4168_s29 = scalar_lea.hbm %s4822_s7, 1024 }
 0x392   : > { %p4165_p6 = scmp.ne.s32.totalorder %s4772_s1, %s4164_s10  ;;  %p4169_p3 = scmp.lt.s32.totalorder %s4772_s1, %s4822_s7 }
 0x393   : > { %p4170_p11 = scmp.lt.s32.totalorder %s4168_s29, %s4164_s10 }
 0x394   : > { %p4166_p4 = pnand %p4165_p6, %p4871_p1 }
 0x395   : > { %p4171_p5 = por %p4170_p11, %p4169_p3 }
 0x396   : > { %p4167_p8 = pneg %p4166_p4 }
 0x398   : > { %p4172_p7 = pnand %p4171_p5, %p4167_p8 }
 0x39a   : > { %4175 = shalt.err (!%p4172_p7)
}
 0x39b   : > { %s4232_s18 = smov 64   ;;  %s4233_s23 = smov 4  }
 0x39c   : > { %3864 = dma.vmem_to_hbm [thread:$0]  (%p4871_p1), %s4767_s21, 512, %s4772_s1, %s3107_s16, %s4232_s18, %s4232_s18, %s4233_s23  }
 0x39d PF: > { %s3135_s12 = sand.u32 1, %s4210_s24   ;;  %p4872_p12 = scmp.ne.s32.totalorder %s4831_s8, 0 }
 0x39e   : > { %p4873_p9 = scmp.ge.s32.totalorder %s4222_s27, 2  ;;  %s3136_s28 = scalar_lea.sflag [#allocation6], %s3135_s12 }
 0x3a0   : > { %p3881_p13 = pnand %p4873_p9, %p4872_p12 }
 0x3a2   : > { %p3882_p0 = pneg %p3881_p13 }
 0x3a4   : > { %4205 = dma.done.wait (%p3882_p0), %s3136_s28, 512  }
 0x3a5   : > { %4207 = vsyncadd (%p3882_p0), %s3136_s28, 4294966784  ;;  %p22_p2 = scmp.ge.s32.totalorder %s4363_s14, 4   ;;  %s4874_s24 = smov %s4214_s25 }
 0x3a6   : > { %s4875_s25 = smov %s4218_s26  ;;  %s4876_s26 = smov %s4373_s17 }
 0x3a7   : > { %s4877_s27 = smov %s4363_s14  ;;  %24 = sbr.rel (!%p22_p2) target bundleno = 9 (0x9), region = 116 }
 0x3ac   :  { %3141 = vsyncpa [#allocation5], 1 }
 0x3ad   :  { %3143 = vsyncpa [#allocation5 + $0x1], 1 }
 0x3ae   :  { %3144 = vsyncpa [#allocation8], 1 }
 0x3af   :  { %3145 = vsyncpa [#allocation11], 1 }
 0x3b0   :  { %3146 = vsyncpa [#allocation6], 1 }
 0x3b1   :  { %3148 = vsyncpa [#allocation6 + $0x1], 1 }

</bundles_post_ra>
